<compile_context>
chip_gen: v7x
topology: tpu7x:2x2x1
jax: 0.10.0
libtpu: 0.0.40
codegen_flags: <defaults>
</compile_context>

<pallas_src>
import functools
import math

import jax
import jax.numpy as jnp
from jax.experimental import pallas as pl
from jax.experimental.pallas import tpu as pltpu

_LANE = 128
# Budget for keeping the whole (double-buffered) bf16 embedding VMEM-resident.
_RESIDENT_EMB_BUDGET = 12 * 1024 * 1024


def _round_up(x, m):
    return ((x + m - 1) // m) * m


# ----------------------------- Pallas kernel --------------------------------
def _lightgcn_layer_kernel(adj_ref, emb_ref, sum_ref, new_emb_ref, new_sum_ref,
                           acc_ref, *, tk, scale, emb_resident):
    """One (row-tile i, k-tile k) grid step of

         new_emb = adj @ emb                       (bf16 MXU inputs, f32 acc)
         new_sum = (layer_sum + new_emb) * scale   (k == last epilogue)

    acc_ref is a (tm, dp) f32 VMEM scratch; both outputs are written only in
    the k == last epilogue (single writeback per row tile).
    """
    k = pl.program_id(1)

    if emb_resident:
        koff = pl.multiple_of(k * tk, tk)
        e_tile = emb_ref[pl.ds(koff, tk), :]          # bf16 slice, no cast
    else:
        e_tile = emb_ref[...]                          # streamed (tk, dp) tile

    part = jnp.dot(adj_ref[...], e_tile, preferred_element_type=jnp.float32)

    @pl.when(k == 0)
    def _():
        acc_ref[...] = part                            # direct write, no zero-init

    @pl.when(k != 0)
    def _():
        acc_ref[...] += part

    @pl.when(k == pl.num_programs(1) - 1)
    def _():
        acc = acc_ref[...]
        new_emb_ref[...] = acc.astype(new_emb_ref.dtype)
        s = sum_ref[...] + acc
        if scale != 1.0:                               # fused 1/(L+1) on last layer
            s = s * jnp.float32(scale)
        new_sum_ref[...] = s


def _lightgcn_layer(adj_bf16, emb_bf16, layer_sum, *, tm, tk, scale):
    """(new_emb_bf16, new_sum_f32) = (adj @ emb, (layer_sum + adj @ emb) * scale)."""
    m, k = adj_bf16.shape
    k2, dp = emb_bf16.shape
    assert k == k2 and m % tm == 0 and k % tk == 0 and dp % _LANE == 0

    # Keep the whole embedding VMEM-resident (constant index_map -> fetched
    # once) when it fits comfortably; otherwise stream (tk, dp) tiles.
    emb_resident = (2 * k * dp * 2) <= _RESIDENT_EMB_BUDGET
    if emb_resident:
        emb_spec = pl.BlockSpec((k, dp), lambda i, kk: (0, 0))
        emb_vmem = 2 * k * dp * 2
    else:
        emb_spec = pl.BlockSpec((tk, dp), lambda i, kk: (kk, 0))
        emb_vmem = 2 * tk * dp * 2

    kernel = functools.partial(
        _lightgcn_layer_kernel, tk=tk, scale=scale, emb_resident=emb_resident)

    cost = pl.CostEstimate(
        flops=2 * m * k * dp,
        transcendentals=0,
        bytes_accessed=(m * k * 2            # adj stream (dominant)
                        + k * dp * 2         # embedding (bf16)
                        + m * dp * 4         # running sum in
                        + m * dp * (2 + 4)), # bf16 + f32 outputs
    )

    # Explicit VMEM budget: adj tiles (double-buffered) + emb + row tiles + scratch.
    need = (2 * tm * tk * 2 + emb_vmem
            + 2 * tm * dp * 4          # layer_sum blocks
            + 2 * tm * dp * (2 + 4)    # output blocks
            + tm * dp * 4)             # f32 accumulator scratch
    vmem_limit = min(max(int(need * 1.5) + (2 << 20), 32 * 1024 * 1024),
                     96 * 1024 * 1024)

    return pl.pallas_call(
        kernel,
        out_shape=(
            jax.ShapeDtypeStruct((m, dp), jnp.bfloat16),   # new_emb (stays bf16)
            jax.ShapeDtypeStruct((m, dp), jnp.float32),    # new_sum
        ),
        grid_spec=pltpu.PrefetchScalarGridSpec(
            num_scalar_prefetch=0,
            grid=(m // tm, k // tk),
            in_specs=[
                pl.BlockSpec((tm, tk), lambda i, kk: (i, kk)),   # adj tile (bf16)
                emb_spec,                                        # embedding
                pl.BlockSpec((tm, dp), lambda i, kk: (i, 0)),    # running sum
            ],
            out_specs=(
                pl.BlockSpec((tm, dp), lambda i, kk: (i, 0)),
                pl.BlockSpec((tm, dp), lambda i, kk: (i, 0)),
            ),
            scratch_shapes=[pltpu.VMEM((tm, dp), jnp.float32)],
        ),
        compiler_params=pltpu.CompilerParams(
            dimension_semantics=("parallel", "arbitrary"),
            vmem_limit_bytes=vmem_limit,
        ),
        cost_estimate=cost,
        input_output_aliases={2: 1},        # layer_sum buffer reused for new_sum
    )(adj_bf16, emb_bf16, layer_sum)


# ----------------------------- layer stacks ---------------------------------
@functools.partial(jax.jit, static_argnames=("num_layers", "tm", "tk"))
def _run_dense_stack(adj_bf16, ego_p, *, num_layers, tm, tk):
    cur = ego_p.astype(jnp.bfloat16)
    layer_sum = ego_p
    inv = 1.0 / float(num_layers + 1)
    for l in range(num_layers):
        scale = inv if l == num_layers - 1 else 1.0
        cur, layer_sum = _lightgcn_layer(adj_bf16, cur, layer_sum,
                                         tm=tm, tk=tk, scale=scale)
    return layer_sum


@functools.partial(jax.jit, static_argnames=("num_layers", "tm", "tk"))
def _run_bipartite_stack(r_bf16, rt_bf16, a0, p0, *, num_layers, tm, tk):
    cur_a, cur_p = a0.astype(jnp.bfloat16), p0.astype(jnp.bfloat16)
    sum_a, sum_p = a0, p0
    inv = 1.0 / float(num_layers + 1)
    for l in range(num_layers):
        scale = inv if l == num_layers - 1 else 1.0
        new_a, sum_a = _lightgcn_layer(r_bf16, cur_p, sum_a, tm=tm, tk=tk, scale=scale)
        new_p, sum_p = _lightgcn_layer(rt_bf16, cur_a, sum_p, tm=tm, tk=tk, scale=scale)
        cur_a, cur_p = new_a, new_p
    return sum_a, sum_p


# ----------------------------- LightGCN forward ------------------------------
def lightgcn_forward(author_embedding, paper_embedding, norm_adj, *,
                     n_authors, n_papers, num_layers, tm=256, tk=1024):
    """Mirrors LightGCN.forward with a generic dense norm_adj operator."""
    ego_embedding = jnp.concatenate([author_embedding, paper_embedding], axis=0)
    n, d = ego_embedding.shape
    assert norm_adj.shape == (n, n)

    dp = _round_up(d, _LANE)
    tm = min(tm, _round_up(n, _LANE))
    tk = min(tk, _round_up(n, _LANE))
    n_pad = _round_up(n, math.lcm(tm, tk))

    adj_bf16 = jnp.pad(norm_adj.astype(jnp.float32),
                       ((0, n_pad - n), (0, n_pad - n))).astype(jnp.bfloat16)
    ego_p = jnp.pad(ego_embedding.astype(jnp.float32),
                    ((0, n_pad - n), (0, dp - d)))

    if num_layers == 0:
        out = ego_embedding
    else:
        layer_sum = _run_dense_stack(adj_bf16, ego_p,
                                     num_layers=num_layers, tm=tm, tk=tk)
        out = layer_sum[:n, :d]

    return ego_embedding, out[:n_authors], out[n_authors:n_authors + n_papers]


def lightgcn_forward_bipartite(author_embedding, paper_embedding, norm_r, *,
                               num_layers, tm=256, tk=1024):
    """Same math for the standard bipartite norm_adj = [[0, R], [R^T, 0]]:
    only R / R^T are streamed (half the FLOPs and adjacency HBM bytes)."""
    na, d = author_embedding.shape
    nb, d2 = paper_embedding.shape
    assert d == d2 and norm_r.shape == (na, nb)

    dp = _round_up(d, _LANE)
    tm = min(tm, _round_up(min(na, nb), _LANE))
    tk = min(tk, _round_up(min(na, nb), _LANE))
    g = math.lcm(tm, tk)
    na_p, nb_p = _round_up(na, g), _round_up(nb, g)

    r = jnp.pad(norm_r.astype(jnp.float32), ((0, na_p - na), (0, nb_p - nb)))
    r_bf16, rt_bf16 = r.astype(jnp.bfloat16), r.T.astype(jnp.bfloat16)

    a0 = jnp.pad(author_embedding.astype(jnp.float32), ((0, na_p - na), (0, dp - d)))
    p0 = jnp.pad(paper_embedding.astype(jnp.float32), ((0, nb_p - nb), (0, dp - d)))

    ego_embedding = jnp.concatenate([author_embedding, paper_embedding], axis=0)
    if num_layers == 0:
        return ego_embedding, author_embedding, paper_embedding

    sum_a, sum_p = _run_bipartite_stack(r_bf16, rt_bf16, a0, p0,
                                        num_layers=num_layers, tm=tm, tk=tk)
    return ego_embedding, sum_a[:na, :d], sum_p[:nb, :d]


# ----------------------------- deterministic setup ---------------------------
def make_bipartite_norm(key, n_authors, n_papers, p_edge=0.05):
    """Symmetric degree-normalized bipartite adjacency: returns (R_norm, dense)."""
    r = jax.random.bernoulli(key, p_edge, (n_authors, n_papers)).astype(jnp.float32)
    deg_a = jnp.maximum(r.sum(axis=1), 1.0)
    deg_p = jnp.maximum(r.sum(axis=0), 1.0)
    r_norm = r / jnp.sqrt(deg_a)[:, None] / jnp.sqrt(deg_p)[None, :]
    n = n_authors + n_papers
    adj = jnp.zeros((n, n), jnp.float32)
    adj = adj.at[:n_authors, n_authors:].set(r_norm)
    adj = adj.at[n_authors:, :n_authors].set(r_norm.T)
    return r_norm, adj


if __name__ == "__main__":
    # Sizes chosen so that (with tm=128, tk=256) both grid axes are multi-step
    # and the node-count / embedding-dim padding paths are exercised:
    #   n = 760 -> padded 768 (grid rows 6, k-steps 3), d = 96 -> dp = 128.
    n_authors, n_papers, emb_dim, num_layers = 300, 460, 96, 3
    tm, tk = 128, 256

    key = jax.random.PRNGKey(0)
    k_adj, k_auth, k_pap = jax.random.split(key, 3)

    norm_r, norm_adj = make_bipartite_norm(k_adj, n_authors, n_papers)
    author_embedding = jax.random.normal(k_auth, (n_authors, emb_dim), jnp.float32)
    paper_embedding = jax.random.normal(k_pap, (n_papers, emb_dim), jnp.float32)

    # Generic dense path (faithful to the module's arbitrary norm_adj).
    ego, out_a, out_p = lightgcn_forward(
        author_embedding, paper_embedding, norm_adj,
        n_authors=n_authors, n_papers=n_papers, num_layers=num_layers,
        tm=tm, tk=tk)
    # Bipartite fast path (half the adjacency bytes / FLOPs).
    ego2, out_a2, out_p2 = lightgcn_forward_bipartite(
        author_embedding, paper_embedding, norm_r,
        num_layers=num_layers, tm=tm, tk=tk)
    jax.block_until_ready((ego, out_a, out_p, ego2, out_a2, out_p2))

    # Pure-JAX reference emulating the kernel's quantization (bf16 adjacency,
    # bf16 per-layer embeddings, f32 accumulation / running sum).
    adj_ref = norm_adj.astype(jnp.bfloat16).astype(jnp.float32)
    ego_ref = jnp.concatenate([author_embedding, paper_embedding], 0)
    cur, s = ego_ref, ego_ref
    for _ in range(num_layers):
        cur = adj_ref @ cur.astype(jnp.bfloat16).astype(jnp.float32)
        s = s + cur
    out_ref = s / (num_layers + 1)

    assert jnp.allclose(ego, ego_ref, atol=1e-6)
    assert jnp.allclose(out_a, out_ref[:n_authors], atol=1e-2, rtol=1e-2)
    assert jnp.allclose(out_p, out_ref[n_authors:], atol=1e-2, rtol=1e-2)
    assert jnp.allclose(ego2, ego_ref, atol=1e-6)
    assert jnp.allclose(out_a2, out_a, atol=1e-2, rtol=1e-2)
    assert jnp.allclose(out_p2, out_p, atol=1e-2, rtol=1e-2)

    print("KERNEL_OK")
</pallas_src>

<mosaic_0001>
module attributes {stable_mosaic.version = 11 : i64} {
  func.func @_lightgcn_layer_kernel(%arg0: i32, %arg1: i32, %arg2: memref<128x256xbf16, #tpu.memory_space<vmem>>, %arg3: memref<768x128xbf16, #tpu.memory_space<vmem>>, %arg4: memref<128x128xf32, #tpu.memory_space<vmem>>, %arg5: memref<128x128xbf16, #tpu.memory_space<vmem>>, %arg6: memref<128x128xf32, #tpu.memory_space<vmem>>, %arg7: memref<128x128xf32, #tpu.memory_space<vmem>>) attributes {dimension_semantics = [#tpu.dimension_semantics<parallel>, #tpu.dimension_semantics<arbitrary>], iteration_bounds = array<i64: 6, 3>, scalar_prefetch = 0 : i64, scratch_operands = 1 : i64, tpu.core_type = #tpu.core_type<tc>, window_params = [{transform_indices = @transform_0, window_bounds = array<i64: 128, 256>}, {pipeline_mode = #tpu.pipeline_mode<synchronous>, transform_indices = @transform_1, window_bounds = array<i64: 768, 128>}, {transform_indices = @transform_2, window_bounds = array<i64: 128, 128>}, {transform_indices = @transform_3, window_bounds = array<i64: 128, 128>}, {transform_indices = @transform_4, window_bounds = array<i64: 128, 128>}]} {
    %c256_i32 = arith.constant 256 : i32
    %0 = arith.muli %arg1, %c256_i32 : i32
    %1 = tpu.assume_multiple %0, 256 : i32
    %2 = arith.index_cast %1 : i32 to index
    %c0 = arith.constant 0 : index
    %3 = vector.load %arg3[%2, %c0] : memref<768x128xbf16, #tpu.memory_space<vmem>>, vector<256x128xbf16>
    %c0_0 = arith.constant 0 : index
    %c0_1 = arith.constant 0 : index
    %4 = vector.load %arg2[%c0_0, %c0_1] : memref<128x256xbf16, #tpu.memory_space<vmem>>, vector<128x256xbf16>
    %cst = arith.constant dense<0.000000e+00> : vector<128x128xf32>
    %5 = tpu.matmul %4, %3, %cst {dimension_numbers = #tpu.dot_dimension_numbers<[1], [0], [0], [1], [0, 0, 1, 1], [], []>} : vector<128x256xbf16>, vector<256x128xbf16>, vector<128x128xf32> -> vector<128x128xf32>
    %c0_i32 = arith.constant 0 : i32
    %6 = arith.cmpi eq, %arg1, %c0_i32 : i32
    %7 = arith.extui %6 : i1 to i32
    %c0_i32_2 = arith.constant 0 : i32
    %8 = arith.cmpi ne, %7, %c0_i32_2 : i32
    scf.if %8 {
      %c0_6 = arith.constant 0 : index
      %c0_7 = arith.constant 0 : index
      %15 = vector.load %arg7[%c0_6, %c0_7] : memref<128x128xf32, #tpu.memory_space<vmem>>, vector<128x128xf32>
      tpu.vector_store %arg7[%c0_6, %c0_7], %5 {strides = array<i32>} : memref<128x128xf32, #tpu.memory_space<vmem>>, vector<128x128xf32>,
    } else {
    }
    %c0_i32_3 = arith.constant 0 : i32
    %9 = arith.cmpi ne, %arg1, %c0_i32_3 : i32
    %10 = arith.extui %9 : i1 to i32
    %c0_i32_4 = arith.constant 0 : i32
    %11 = arith.cmpi ne, %10, %c0_i32_4 : i32
    scf.if %11 {
      %c0_6 = arith.constant 0 : index
      %c0_7 = arith.constant 0 : index
      %15 = vector.load %arg7[%c0_6, %c0_7] : memref<128x128xf32, #tpu.memory_space<vmem>>, vector<128x128xf32>
      %16 = arith.addf %15, %5 : vector<128x128xf32>
      %c0_8 = arith.constant 0 : index
      %c0_9 = arith.constant 0 : index
      %17 = vector.load %arg7[%c0_8, %c0_9] : memref<128x128xf32, #tpu.memory_space<vmem>>, vector<128x128xf32>
      tpu.vector_store %arg7[%c0_8, %c0_9], %16 {strides = array<i32>} : memref<128x128xf32, #tpu.memory_space<vmem>>, vector<128x128xf32>,
    } else {
    }
    %c2_i32 = arith.constant 2 : i32
    %12 = arith.cmpi eq, %arg1, %c2_i32 : i32
    %13 = arith.extui %12 : i1 to i32
    %c0_i32_5 = arith.constant 0 : i32
    %14 = arith.cmpi ne, %13, %c0_i32_5 : i32
    scf.if %14 {
      %c0_6 = arith.constant 0 : index
      %c0_7 = arith.constant 0 : index
      %15 = vector.load %arg7[%c0_6, %c0_7] : memref<128x128xf32, #tpu.memory_space<vmem>>, vector<128x128xf32>
      %16 = arith.truncf %15 : vector<128x128xf32> to vector<128x128xbf16>
      %c0_8 = arith.constant 0 : index
      %c0_9 = arith.constant 0 : index
      %17 = vector.load %arg5[%c0_8, %c0_9] : memref<128x128xbf16, #tpu.memory_space<vmem>>, vector<128x128xbf16>
      tpu.vector_store %arg5[%c0_8, %c0_9], %16 {strides = array<i32>} : memref<128x128xbf16, #tpu.memory_space<vmem>>, vector<128x128xbf16>,
      %c0_10 = arith.constant 0 : index
      %c0_11 = arith.constant 0 : index
      %18 = vector.load %arg4[%c0_10, %c0_11] : memref<128x128xf32, #tpu.memory_space<vmem>>, vector<128x128xf32>
      %19 = arith.addf %18, %15 : vector<128x128xf32>
      %cst_12 = arith.constant 2.500000e-01 : f32
      %20 = vector.broadcast %cst_12 : f32 to vector<128x128xf32>
      %21 = arith.mulf %19, %20 : vector<128x128xf32>
      %c0_13 = arith.constant 0 : index
      %c0_14 = arith.constant 0 : index
      %22 = vector.load %arg6[%c0_13, %c0_14] : memref<128x128xf32, #tpu.memory_space<vmem>>, vector<128x128xf32>
      tpu.vector_store %arg6[%c0_13, %c0_14], %21 {strides = array<i32>} : memref<128x128xf32, #tpu.memory_space<vmem>>, vector<128x128xf32>,
    } else {
    }
    return
  }
  func.func @transform_0(%arg0: i32, %arg1: i32) -> (i32, i32) {
    %c0_i32 = arith.constant 0 : i32
    return %arg0, %arg1 : i32, i32
  }
  func.func @transform_1(%arg0: i32, %arg1: i32) -> (i32, i32) {
    %c0_i32 = arith.constant 0 : i32
    %c0_i32_0 = arith.constant 0 : i32
    %c0_i32_1 = arith.constant 0 : i32
    return %c0_i32, %c0_i32_0 : i32, i32
  }
  func.func @transform_2(%arg0: i32, %arg1: i32) -> (i32, i32) {
    %c0_i32 = arith.constant 0 : i32
    %c0_i32_0 = arith.constant 0 : i32
    return %arg0, %c0_i32 : i32, i32
  }
  func.func @transform_3(%arg0: i32, %arg1: i32) -> (i32, i32) {
    %c0_i32 = arith.constant 0 : i32
    %c0_i32_0 = arith.constant 0 : i32
    return %arg0, %c0_i32 : i32, i32
  }
  func.func @transform_4(%arg0: i32, %arg1: i32) -> (i32, i32) {
    %c0_i32 = arith.constant 0 : i32
    %c0_i32_0 = arith.constant 0 : i32
    return %arg0, %c0_i32 : i32, i32
  }
}

module attributes {stable_mosaic.version = 11 : i64} {
  func.func @_lightgcn_layer_kernel(%arg0: i32, %arg1: i32, %arg2: memref<128x256xbf16, #tpu.memory_space<vmem>>, %arg3: memref<768x128xbf16, #tpu.memory_space<vmem>>, %arg4: memref<128x128xf32, #tpu.memory_space<vmem>>, %arg5: memref<128x128xbf16, #tpu.memory_space<vmem>>, %arg6: memref<128x128xf32, #tpu.memory_space<vmem>>, %arg7: memref<128x128xf32, #tpu.memory_space<vmem>>) attributes {dimension_semantics = [#tpu.dimension_semantics<parallel>, #tpu.dimension_semantics<arbitrary>], iteration_bounds = array<i64: 6, 3>, scalar_prefetch = 0 : i64, scratch_operands = 1 : i64, tpu.core_type = #tpu.core_type<tc>, window_params = [{transform_indices = @transform_0, window_bounds = array<i64: 128, 256>}, {pipeline_mode = #tpu.pipeline_mode<synchronous>, transform_indices = @transform_1, window_bounds = array<i64: 768, 128>}, {transform_indices = @transform_2, window_bounds = array<i64: 128, 128>}, {transform_indices = @transform_3, window_bounds = array<i64: 128, 128>}, {transform_indices = @transform_4, window_bounds = array<i64: 128, 128>}]} {
    %c256_i32 = arith.constant 256 : i32
    %0 = arith.muli %arg1, %c256_i32 : i32
    %1 = tpu.assume_multiple %0, 256 : i32
    %2 = arith.index_cast %1 : i32 to index
    %c0 = arith.constant 0 : index
    %3 = vector.load %arg3[%2, %c0] : memref<768x128xbf16, #tpu.memory_space<vmem>>, vector<256x128xbf16>
    %c0_0 = arith.constant 0 : index
    %c0_1 = arith.constant 0 : index
    %4 = vector.load %arg2[%c0_0, %c0_1] : memref<128x256xbf16, #tpu.memory_space<vmem>>, vector<128x256xbf16>
    %cst = arith.constant dense<0.000000e+00> : vector<128x128xf32>
    %5 = tpu.matmul %4, %3, %cst {dimension_numbers = #tpu.dot_dimension_numbers<[1], [0], [0], [1], [0, 0, 1, 1], [], []>} : vector<128x256xbf16>, vector<256x128xbf16>, vector<128x128xf32> -> vector<128x128xf32>
    %c0_i32 = arith.constant 0 : i32
    %6 = arith.cmpi eq, %arg1, %c0_i32 : i32
    %7 = arith.extui %6 : i1 to i32
    %c0_i32_2 = arith.constant 0 : i32
    %8 = arith.cmpi ne, %7, %c0_i32_2 : i32
    scf.if %8 {
      %c0_6 = arith.constant 0 : index
      %c0_7 = arith.constant 0 : index
      %15 = vector.load %arg7[%c0_6, %c0_7] : memref<128x128xf32, #tpu.memory_space<vmem>>, vector<128x128xf32>
      tpu.vector_store %arg7[%c0_6, %c0_7], %5 {strides = array<i32>} : memref<128x128xf32, #tpu.memory_space<vmem>>, vector<128x128xf32>,
    } else {
    }
    %c0_i32_3 = arith.constant 0 : i32
    %9 = arith.cmpi ne, %arg1, %c0_i32_3 : i32
    %10 = arith.extui %9 : i1 to i32
    %c0_i32_4 = arith.constant 0 : i32
    %11 = arith.cmpi ne, %10, %c0_i32_4 : i32
    scf.if %11 {
      %c0_6 = arith.constant 0 : index
      %c0_7 = arith.constant 0 : index
      %15 = vector.load %arg7[%c0_6, %c0_7] : memref<128x128xf32, #tpu.memory_space<vmem>>, vector<128x128xf32>
      %16 = arith.addf %15, %5 : vector<128x128xf32>
      %c0_8 = arith.constant 0 : index
      %c0_9 = arith.constant 0 : index
      %17 = vector.load %arg7[%c0_8, %c0_9] : memref<128x128xf32, #tpu.memory_space<vmem>>, vector<128x128xf32>
      tpu.vector_store %arg7[%c0_8, %c0_9], %16 {strides = array<i32>} : memref<128x128xf32, #tpu.memory_space<vmem>>, vector<128x128xf32>,
    } else {
    }
    %c2_i32 = arith.constant 2 : i32
    %12 = arith.cmpi eq, %arg1, %c2_i32 : i32
    %13 = arith.extui %12 : i1 to i32
    %c0_i32_5 = arith.constant 0 : i32
    %14 = arith.cmpi ne, %13, %c0_i32_5 : i32
    scf.if %14 {
      %c0_6 = arith.constant 0 : index
      %c0_7 = arith.constant 0 : index
      %15 = vector.load %arg7[%c0_6, %c0_7] : memref<128x128xf32, #tpu.memory_space<vmem>>, vector<128x128xf32>
      %16 = arith.truncf %15 : vector<128x128xf32> to vector<128x128xbf16>
      %c0_8 = arith.constant 0 : index
      %c0_9 = arith.constant 0 : index
      %17 = vector.load %arg5[%c0_8, %c0_9] : memref<128x128xbf16, #tpu.memory_space<vmem>>, vector<128x128xbf16>
      tpu.vector_store %arg5[%c0_8, %c0_9], %16 {strides = array<i32>} : memref<128x128xbf16, #tpu.memory_space<vmem>>, vector<128x128xbf16>,
      %c0_10 = arith.constant 0 : index
      %c0_11 = arith.constant 0 : index
      %18 = vector.load %arg4[%c0_10, %c0_11] : memref<128x128xf32, #tpu.memory_space<vmem>>, vector<128x128xf32>
      %19 = arith.addf %18, %15 : vector<128x128xf32>
      %c0_12 = arith.constant 0 : index
      %c0_13 = arith.constant 0 : index
      %20 = vector.load %arg6[%c0_12, %c0_13] : memref<128x128xf32, #tpu.memory_space<vmem>>, vector<128x128xf32>
      tpu.vector_store %arg6[%c0_12, %c0_13], %19 {strides = array<i32>} : memref<128x128xf32, #tpu.memory_space<vmem>>, vector<128x128xf32>,
    } else {
    }
    return
  }
  func.func @transform_0(%arg0: i32, %arg1: i32) -> (i32, i32) {
    %c0_i32 = arith.constant 0 : i32
    return %arg0, %arg1 : i32, i32
  }
  func.func @transform_1(%arg0: i32, %arg1: i32) -> (i32, i32) {
    %c0_i32 = arith.constant 0 : i32
    %c0_i32_0 = arith.constant 0 : i32
    %c0_i32_1 = arith.constant 0 : i32
    return %c0_i32, %c0_i32_0 : i32, i32
  }
  func.func @transform_2(%arg0: i32, %arg1: i32) -> (i32, i32) {
    %c0_i32 = arith.constant 0 : i32
    %c0_i32_0 = arith.constant 0 : i32
    return %arg0, %c0_i32 : i32, i32
  }
  func.func @transform_3(%arg0: i32, %arg1: i32) -> (i32, i32) {
    %c0_i32 = arith.constant 0 : i32
    %c0_i32_0 = arith.constant 0 : i32
    return %arg0, %c0_i32 : i32, i32
  }
  func.func @transform_4(%arg0: i32, %arg1: i32) -> (i32, i32) {
    %c0_i32 = arith.constant 0 : i32
    %c0_i32_0 = arith.constant 0 : i32
    return %arg0, %c0_i32 : i32, i32
  }
}

</mosaic_0001>

<bundles_post_ra>
// kernel: _run_dense_stack.3
= control target key start
LH: loop header
LB: loop body
LE: loop exit
PB: predicated region body
PF: predicated region fallthrough
CT: control target
= control target key end

     0   :  { %s1414_s15 = smov 0   ;;  %s1416_s16 = smov 0   ;;  %s1655_s0 = inlined_call_operand.vmem [shape: bf16[768,768], index: 0, kind: input, shape index: {}]   ;;  %s1656_s1 = inlined_call_operand.vmem [shape: bf16[768,128], index: 1, kind: input, shape index: {}]   ;;  %s1657_s2 = inlined_call_operand.vmem [shape: f32[768,128], index: 2, kind: input, shape index: {}, may-alias: {2,4}]   ;;  %s1658_s3 = inlined_call_operand.vmem [shape: bf16[768,128], index: 3, kind: output, shape index: {0}]   ;;  %s1659_s4 = inlined_call_operand.vmem [shape: f32[768,128], index: 4, kind: output, shape index: {1}, may-alias: {2,4}]  }
   0x1   :  { %s1418_s17 = smov 0   ;;  %s1420_s18 = smov 0  }
   0x2   :  { %s1422_s19 = smov 0   ;;  %s1424_s20 = smov 0  }
   0x3   :  { %s1426_s21 = smov 0  }
   0x4 LB: > { %s24_s22 = sadd.s32 1, %s1379_s19  ;;  %s27_s23 = sadd.s32 1, %s1383_s20  ;;  %s1387_s21 = sphi %s1426_s21, %s15_s21   ;;  %s1383_s20 = sphi %s1424_s20, %s1665_s20   ;;  %s1379_s19 = sphi %s1422_s19, %s1664_s19   ;;  %s1375_s18 = sphi %s1420_s18, %s1663_s18   ;;  %s1371_s17 = sphi %s1418_s17, %s1662_s17   ;;  %s1367_s16 = sphi %s1416_s16, %s1661_s16   ;;  %s1363_s15 = sphi %s1414_s15, %s1660_s15  }
   0x5   : > { %p25_p0 = scmp.ge.s32.totalorder %s24_s22, 3  ;;  %p43_p1 = scmp.ne.s32.totalorder %s1367_s16, %s1363_s15 }
   0x6   : > { %p44_p2 = scmp.eq.s32.totalorder %s1387_s21, 0  ;;  %s36_s27 = sadd.s32 1, %s1367_s16 }
   0x7   : > { %s1667_s22 = smov (%p25_p0, %s24_s22), 0  ;;  %s1669_s23 = smov (!%p25_p0, %s27_s23), %s1383_s20 }
   0x8   : > { %p45_p3 = por %p44_p2, %p43_p1  ;;  %p29_p4 = scmp.ge.s32.totalorder %s1669_s23, 6 }
   0x9   : > { %s32_s24 = ssub.s32 %s1379_s19, %s1667_s22  ;;  %p1024_p6 = scmp.ge.s32.totalorder %s1387_s21, 18 }
   0xa   : > { %s1671_s23 = smov (%p29_p4, %s1669_s23), 0 }
   0xb   : > { %s31_s25 = ssub.s32 %s1383_s20, %s1671_s23  ;;  %171 = sbr.rel (%p1024_p6) target bundleno = 34 (0x22), region = 20 }
   0xc   : > { %s33_s26 = sor.u32 %s32_s24, %s31_s25 }
   0xd   : > { %p34_p5 = scmp.eq.s32.totalorder %s33_s26, 0 }
   0xf   : > { %s1465_s28 = scalar_select %p34_p5, %s1367_s16, %s36_s27  }
  0x12   : > { %174 = sbr.rel (!%p45_p3) target bundleno = 34 (0x22), region = 24  ;;  %s176_s29 = sand.u32 (%p45_p3), 1, %s1367_s16  }
  0x13   : > { %s1027_s30 = sshll.u32 (%p45_p3), %s1379_s19, 1  ;;  %s1025_s5 = sshll.u32 (%p45_p3), %s176_s29, 7 }
  0x14   : > { %s1236_s6 = smul.u32 (%p45_p3), 96, %s1383_s20  ;;  %s178_s12 = scalar_lea.vmem (%p45_p3), [#allocation3], %s1025_s5 }
  0x16   : > { %s182_s7 = sadd.s32 (%p45_p3), %s1236_s6, %s1027_s30 }
  0x17   : > { %s1029_s8 = sshll.u32 (%p45_p3), %s182_s7, 2 }
  0x18   : > { %s1474_s11 = scalar_lea.vmem (%p45_p3), %s1655_s0, %s1029_s8 }
  0x19   : > { %v242_v0 = vld [vmem:[%s1474_s11] sm:$0xff]  ;;  %v244_v1 = vld [vmem:[%s1474_s11 + $0x18] sm:$0xff]  ;;  %v246_v2 = vld [vmem:[%s1474_s11 + $0x30] sm:$0xff] }
  0x1a   : > { %243 = vst [vmem:[%s178_s12] sm:$0xff] %v242_v0  ;;  %245 = vst [vmem:[%s178_s12 + $0x8] sm:$0xff] %v244_v1  ;;  %v248_v3 = vld [vmem:[%s1474_s11 + $0x48] sm:$0xff]  ;;  %v250_v4 = vld [vmem:[%s1474_s11 + $0x60] sm:$0xff] }
  0x1b   : > { %247 = vst [vmem:[%s178_s12 + $0x10] sm:$0xff] %v246_v2  ;;  %v252_v5 = vld [vmem:[%s1474_s11 + $0x78] sm:$0xff]  ;;  %249 = vst [vmem:[%s178_s12 + $0x18] sm:$0xff] %v248_v3  ;;  %v254_v6 = vld [vmem:[%s1474_s11 + $0x90] sm:$0xff] }
  0x1c   : > { %251 = vst [vmem:[%s178_s12 + $0x20] sm:$0xff] %v250_v4  ;;  %253 = vst [vmem:[%s178_s12 + $0x28] sm:$0xff] %v252_v5  ;;  %v256_v7 = vld [vmem:[%s1474_s11 + $0xa8] sm:$0xff]  ;;  %v258_v8 = vld [vmem:[%s1474_s11 + $0xc0] sm:$0xff] }
  0x1d   : > { %255 = vst [vmem:[%s178_s12 + $0x30] sm:$0xff] %v254_v6  ;;  %257 = vst [vmem:[%s178_s12 + $0x38] sm:$0xff] %v256_v7  ;;  %v260_v9 = vld [vmem:[%s1474_s11 + $0xd8] sm:$0xff]  ;;  %v262_v10 = vld [vmem:[%s1474_s11 + $0xf0] sm:$0xff] }
  0x1e   : > { %259 = vst [vmem:[%s178_s12 + $0x40] sm:$0xff] %v258_v8  ;;  %v264_v11 = vld [vmem:[%s1474_s11 + $0x108] sm:$0xff]  ;;  %261 = vst [vmem:[%s178_s12 + $0x48] sm:$0xff] %v260_v9  ;;  %v266_v12 = vld [vmem:[%s1474_s11 + $0x120] sm:$0xff] }
  0x1f   : > { %263 = vst [vmem:[%s178_s12 + $0x50] sm:$0xff] %v262_v10  ;;  %265 = vst [vmem:[%s178_s12 + $0x58] sm:$0xff] %v264_v11  ;;  %v268_v13 = vld [vmem:[%s1474_s11 + $0x138] sm:$0xff]  ;;  %v270_v14 = vld [vmem:[%s1474_s11 + $0x150] sm:$0xff] }
  0x20   : > { %267 = vst [vmem:[%s178_s12 + $0x60] sm:$0xff] %v266_v12  ;;  %269 = vst [vmem:[%s178_s12 + $0x68] sm:$0xff] %v268_v13  ;;  %v272_v15 = vld [vmem:[%s1474_s11 + $0x168] sm:$0xff] }
  0x21   : > { %271 = vst [vmem:[%s178_s12 + $0x70] sm:$0xff] %v270_v14  ;;  %273 = vst [vmem:[%s178_s12 + $0x78] sm:$0xff] %v272_v15 }
  0x22 PF: > { %p1030_p7 = scmp.ge.s32.totalorder %s1387_s21, 1  ;;  %p287_p8 = scmp.lt.s32.totalorder %s1387_s21, 19 }
  0x24   : > { %p288_p9 = pnand %p1030_p7, %p287_p8 }
  0x25   : > { %s1032_s13 = sshll.u32 (!%p288_p9), %s1375_s18, 4  ;;  %s1038_s14 = sshll.u32 (!%p288_p9), %s1371_s17, 8 }
  0x26   : > { %291 = sbr.rel (%p288_p9) target bundleno = 350 (0x15e), region = 66  ;;  %p332_p10 = scmp.lt.s32.totalorder (!%p288_p9), %s1032_s13, 95 }
  0x27   : > { %s351_s24 = sshra.s32 (!%p288_p9), %s1038_s14, 3  ;;  %p1072_p11 = scmp.ne.s32.totalorder (!%p288_p9), %s1371_s17, 0 }
  0x28   : > { %s1039_s25 = sshll.u32 (!%p288_p9), %s351_s24, 2 }
  0x29   : > { %s1499_s29 = scalar_lea.vmem (!%p288_p9), %s1656_s1, %s1039_s25 }
  0x2a   : > { %v1293_v16 = vld [vmem:[%s1499_s29 + $0x40] sm:$0xff] (!%p288_p9)   ;;  %v1295_v18 = vld [vmem:[%s1499_s29 + $0x48] sm:$0xff] (!%p288_p9)   ;;  %v1297_v20 = vld [vmem:[%s1499_s29 + $0x50] sm:$0xff] (!%p288_p9)  }
  0x2b   : > { %v1294_v17 = vld [vmem:[%s1499_s29] sm:$0xff] (!%p288_p9)   ;;  %1156 = vmatprep.subr.bf16.mxu0 (!%p288_p9), %v1293_v16  ;;  %1220 = vmatprep.subr.bf16.mxu1 (!%p288_p9), %v1293_v16  ;;  %v1296_v19 = vld [vmem:[%s1499_s29 + $0x8] sm:$0xff] (!%p288_p9)   ;;  %v1298_v21 = vld [vmem:[%s1499_s29 + $0x10] sm:$0xff] (!%p288_p9)  }
  0x2c   : > { %1157 = vmatpush3.bf16.msra.mxu0 (!%p288_p9), %v1294_v17  ;;  %1228 = vmatpush3.bf16.msra.mxu1 (!%p288_p9), %v1294_v17  ;;  %v1299_v22 = vld [vmem:[%s1499_s29 + $0x58] sm:$0xff] (!%p288_p9)   ;;  %v1301_v24 = vld [vmem:[%s1499_s29 + $0x60] sm:$0xff] (!%p288_p9)   ;;  %v1303_v26 = vld [vmem:[%s1499_s29 + $0x68] sm:$0xff] (!%p288_p9)  }
  0x2d   : > { %s1673_s13 = smov (!%p332_p10, %s1032_s13), 95  ;;  %1158 = vmatprep.subr.bf16.mxu0 %v1295_v18  ;;  %1221 = vmatprep.subr.bf16.mxu1 %v1295_v18  ;;  %v1300_v23 = vld [vmem:[%s1499_s29 + $0x18] sm:$0xff]   ;;  %v1302_v25 = vld [vmem:[%s1499_s29 + $0x20] sm:$0xff]   ;;  %v1304_v29 = vld [vmem:[%s1499_s29 + $0x28] sm:$0xff]  }
  0x2e   : > { %s1033_s30 = sshll.u32 %s1673_s13, 3  ;;  %s1035_s5 = sshll.u32 %s1673_s13, 2  ;;  %v1305_v30 = vld [vmem:[%s1499_s29 + $0x70] sm:$0xff]   ;;  %v1307_v32 = vld [vmem:[%s1499_s29 + $0x78] sm:$0xff]  }
  0x2f   : > { %s1504_s18 = scalar_lea.vmem %s1657_s2, %s1033_s30  ;;  %s1509_s10 = scalar_lea.vmem %s1658_s3, %s1035_s5  ;;  %v1306_v31 = vld [vmem:[%s1499_s29 + $0x30] sm:$0xff]   ;;  %v1308_v33 = vld [vmem:[%s1499_s29 + $0x38] sm:$0xff]  }
  0x30   : > { %s1515_s14 = scalar_lea.vmem %s1659_s4, %s1033_s30  ;;  %1159 = vmatpush3.bf16.msra.mxu0 %v1296_v19  ;;  %1229 = vmatpush3.bf16.msra.mxu1 %v1296_v19  ;;  %s294_s13 = sand.u32 1, %s1363_s15  }
  0x31   : > { %1160 = vmatprep.subr.bf16.mxu0 %v1297_v20  ;;  %1222 = vmatprep.subr.bf16.mxu1 %v1297_v20  ;;  %s1031_s24 = sshll.u32 %s294_s13, 7 }
  0x32   : > { %s1527_s25 = scalar_lea.vmem [#allocation3], %s1031_s24 }
  0x33   : > { %v1311_v27 = vld [vmem:[%s1527_s25 + $0x4] ss:$8 sps:$4 sm:$0xff]   ;;  %v1309_v34 = vld [vmem:[%s1527_s25] ss:$8 sps:$4 sm:$0xff]   ;;  %v1315_v36 = vld [vmem:[%s1527_s25 + $0x14] ss:$8 sps:$4 sm:$0xff]  }
  0x34   : > { %1161 = vmatpush3.bf16.msra.mxu0 %v1298_v21  ;;  %1230 = vmatpush3.bf16.msra.mxu1 %v1298_v21  ;;  %v1314_v28 = vld [vmem:[%s1527_s25 + $0x44] ss:$8 sps:$4 sm:$0xff]   ;;  %v1312_v35 = vld [vmem:[%s1527_s25 + $0x40] ss:$8 sps:$4 sm:$0xff]   ;;  %v1317_v37 = vld [vmem:[%s1527_s25 + $0x54] ss:$8 sps:$4 sm:$0xff]  }
  0x35   : > { %1162 = vmatprep.subr.bf16.mxu0 %v1299_v22  ;;  %1223 = vmatprep.subr.bf16.mxu1 %v1299_v22  ;;  %v1319_v38 = vld [vmem:[%s1527_s25 + $0x10] ss:$8 sps:$4 sm:$0xff]   ;;  %v1321_v40 = vld [vmem:[%s1527_s25 + $0x24] ss:$8 sps:$4 sm:$0xff]   ;;  %v1325_v42 = vld [vmem:[%s1527_s25 + $0x20] ss:$8 sps:$4 sm:$0xff]  }
  0x36   : > { %611 = vmatprep.mubr.bf16.mxu0 %v1311_v27  ;;  %643 = vmatprep.mubr.bf16.mxu1 %v1314_v28  ;;  %v1320_v39 = vld [vmem:[%s1527_s25 + $0x50] ss:$8 sps:$4 sm:$0xff]   ;;  %v1323_v41 = vld [vmem:[%s1527_s25 + $0x64] ss:$8 sps:$4 sm:$0xff]   ;;  %v1326_v43 = vld [vmem:[%s1527_s25 + $0x60] ss:$8 sps:$4 sm:$0xff]  }
  0x37   : > { %v1327_v44 = vld [vmem:[%s1527_s25 + $0x34] ss:$8 sps:$4 sm:$0xff]   ;;  %v1331_v46 = vld [vmem:[%s1527_s25 + $0x30] ss:$8 sps:$4 sm:$0xff]  }
  0x38   : > { %1163 = vmatpush3.bf16.msra.mxu0 %v1300_v23  ;;  %1231 = vmatpush3.bf16.msra.mxu1 %v1300_v23  ;;  %v1329_v45 = vld [vmem:[%s1527_s25 + $0x74] ss:$8 sps:$4 sm:$0xff]   ;;  %v1332_v47 = vld [vmem:[%s1527_s25 + $0x70] ss:$8 sps:$4 sm:$0xff]  }
  0x39   : > { %1164 = vmatprep.subr.bf16.mxu0 %v1301_v24  ;;  %1224 = vmatprep.subr.bf16.mxu1 %v1301_v24 }
  0x3c   : > { %1165 = vmatpush3.bf16.msra.mxu0 %v1302_v25  ;;  %1232 = vmatpush3.bf16.msra.mxu1 %v1302_v25 }
  0x3d   : > { %1166 = vmatprep.subr.bf16.mxu0 %v1303_v26  ;;  %1225 = vmatprep.subr.bf16.mxu1 %v1303_v26 }
  0x40   : > { %1167 = vmatpush3.bf16.msra.mxu0 %v1304_v29  ;;  %1233 = vmatpush3.bf16.msra.mxu1 %v1304_v29 }
  0x41   : > { %1168 = vmatprep.subr.bf16.mxu0 %v1305_v30  ;;  %1226 = vmatprep.subr.bf16.mxu1 %v1305_v30 }
  0x44   : > { %1169 = vmatpush3.bf16.msra.mxu0 %v1306_v31  ;;  %1234 = vmatpush3.bf16.msra.mxu1 %v1306_v31 }
  0x45   : > { %1170 = vmatprep.subr.bf16.mxu0 %v1307_v32  ;;  %1227 = vmatprep.subr.bf16.mxu1 %v1307_v32 }
  0x48   : > { %1171 = vmatpush3.bf16.msra.mxu0 %v1308_v33  ;;  %1235 = vmatpush3.bf16.msra.mxu1 %v1308_v33 }
  0x4b   : > { %612 = vmatmul.mubr.bf16.vlgmr.msra.gmra.mrb[0].mxu0 %v1309_v34  ;;  %644 = vmatmul.mubr.bf16.vlgmr.msra.gmra.mrb[0].mxu1 %v1312_v35 }
  0x4c   : > { %619 = vmatprep.mubr.bf16.mxu0 %v1315_v36  ;;  %651 = vmatprep.mubr.bf16.mxu1 %v1317_v37 }
  0x53   : > { %620 = vmatmul.mubr.bf16.gmra.mrb[4].mxu0 %v1319_v38  ;;  %652 = vmatmul.mubr.bf16.gmra.mrb[4].mxu1 %v1320_v39 }
  0x54   : > { %627 = vmatprep.mubr.bf16.mxu0 %v1321_v40  ;;  %659 = vmatprep.mubr.bf16.mxu1 %v1323_v41 }
  0x5b   : > { %628 = vmatmul.mubr.bf16.gmra.mrb[8].mxu0 %v1325_v42  ;;  %660 = vmatmul.mubr.bf16.gmra.mrb[8].mxu1 %v1326_v43 }
  0x5c   : > { %635 = vmatprep.mubr.bf16.mxu0 %v1327_v44  ;;  %667 = vmatprep.mubr.bf16.mxu1 %v1329_v45 }
  0x63   : > { %636 = vmatmul.mubr.bf16.gmra.mrb[12].mxu0 %v1331_v46  ;;  %668 = vmatmul.mubr.bf16.gmra.mrb[12].mxu1 %v1332_v47 }
 0x11e   : > { %v1172_v48 = vpop.f32.mrb[0].mxu0  ;;  %v1196_v49 = vpop.f32.mrb[0].mxu1 }
 0x11f   : > { %v1173_v50 = vpop.f32.mrb[1].mxu0  ;;  %v1197_v51 = vpop.f32.mrb[1].mxu1 }
 0x120   : > { %v1551_v52 = vadd.f32 %v1173_v50, %v1172_v48  ;;  %v1553_v53 = vadd.f32 %v1197_v51, %v1196_v49  ;;  %v1175_v54 = vpop.f32.mrb[2].mxu0  ;;  %v1199_v55 = vpop.f32.mrb[2].mxu1 }
 0x121   : > { %v1176_v56 = vpop.f32.mrb[3].mxu0  ;;  %v1200_v57 = vpop.f32.mrb[3].mxu1 }
 0x122   : > { %v1555_v58 = vadd.f32 %v1176_v56, %v1175_v54  ;;  %v1557_v59 = vadd.f32 %v1200_v57, %v1199_v55  ;;  %680 = vst [vmem:[#allocation2] sm:$0xff] (!%p1072_p11), %v1551_v52  ;;  %688 = vst [vmem:[#allocation2 + $0x40] sm:$0xff] (!%p1072_p11), %v1553_v53 }
 0x124   : > { %681 = vst [vmem:[#allocation2 + $0x8] sm:$0xff] (!%p1072_p11), %v1555_v58  ;;  %689 = vst [vmem:[#allocation2 + $0x48] sm:$0xff] (!%p1072_p11), %v1557_v59 }
 0x126   : > { %v1178_v60 = vpop.f32.mrb[4].mxu0  ;;  %v1202_v61 = vpop.f32.mrb[4].mxu1 }
 0x127   : > { %v1179_v62 = vpop.f32.mrb[5].mxu0  ;;  %v1203_v63 = vpop.f32.mrb[5].mxu1 }
 0x128   : > { %v1180_v0 = vadd.f32 %v1179_v62, %v1178_v60  ;;  %v1559_v1 = vadd.f32 %v1203_v63, %v1202_v61  ;;  %v1181_v2 = vpop.f32.mrb[6].mxu0  ;;  %v1205_v3 = vpop.f32.mrb[6].mxu1 }
 0x129   : > { %v1182_v4 = vpop.f32.mrb[7].mxu0  ;;  %v1206_v5 = vpop.f32.mrb[7].mxu1 }
 0x12a   : > { %v1183_v6 = vadd.f32 %v1182_v4, %v1181_v2  ;;  %v1561_v7 = vadd.f32 %v1206_v5, %v1205_v3  ;;  %682 = vst [vmem:[#allocation2 + $0x10] sm:$0xff] (!%p1072_p11), %v1180_v0  ;;  %690 = vst [vmem:[#allocation2 + $0x50] sm:$0xff] (!%p1072_p11), %v1559_v1 }
 0x12c   : > { %683 = vst [vmem:[#allocation2 + $0x18] sm:$0xff] (!%p1072_p11), %v1183_v6  ;;  %691 = vst [vmem:[#allocation2 + $0x58] sm:$0xff] (!%p1072_p11), %v1561_v7 }
 0x12e   : > { %v1184_v8 = vpop.f32.mrb[8].mxu0  ;;  %v1208_v9 = vpop.f32.mrb[8].mxu1 }
 0x12f   : > { %v1185_v10 = vpop.f32.mrb[9].mxu0  ;;  %v1209_v11 = vpop.f32.mrb[9].mxu1 }
 0x130   : > { %v1186_v12 = vadd.f32 %v1185_v10, %v1184_v8  ;;  %v1563_v13 = vadd.f32 %v1209_v11, %v1208_v9  ;;  %v1187_v14 = vpop.f32.mrb[10].mxu0  ;;  %v1211_v15 = vpop.f32.mrb[10].mxu1 }
 0x131   : > { %v1188_v16 = vpop.f32.mrb[11].mxu0  ;;  %v1212_v17 = vpop.f32.mrb[11].mxu1 }
 0x132   : > { %v1189_v18 = vadd.f32 %v1188_v16, %v1187_v14  ;;  %v1565_v19 = vadd.f32 %v1212_v17, %v1211_v15  ;;  %684 = vst [vmem:[#allocation2 + $0x20] sm:$0xff] (!%p1072_p11), %v1186_v12  ;;  %692 = vst [vmem:[#allocation2 + $0x60] sm:$0xff] (!%p1072_p11), %v1563_v13 }
 0x134   : > { %679 = sbr.rel (%p1072_p11) target bundleno = 317 (0x13d), region = 74  ;;  %685 = vst [vmem:[#allocation2 + $0x28] sm:$0xff] (!%p1072_p11), %v1189_v18  ;;  %693 = vst [vmem:[#allocation2 + $0x68] sm:$0xff] (!%p1072_p11), %v1565_v19 }
 0x136   : > { %v1190_v20 = vpop.f32.mrb[12].mxu0  ;;  %v1214_v21 = vpop.f32.mrb[12].mxu1 }
 0x137   : > { %v1191_v22 = vpop.f32.mrb[13].mxu0  ;;  %v1215_v23 = vpop.f32.mrb[13].mxu1 }
 0x138   : > { %v1192_v24 = vadd.f32 %v1191_v22, %v1190_v20  ;;  %v1567_v25 = vadd.f32 %v1215_v23, %v1214_v21  ;;  %v1193_v26 = vpop.f32.mrb[14].mxu0  ;;  %v1217_v27 = vpop.f32.mrb[14].mxu1 }
 0x139   : > { %v1194_v28 = vpop.f32.mrb[15].mxu0  ;;  %v1218_v29 = vpop.f32.mrb[15].mxu1 }
 0x13a   : > { %v1195_v30 = vadd.f32 %v1194_v28, %v1193_v26  ;;  %v1569_v31 = vadd.f32 %v1218_v29, %v1217_v27  ;;  %686 = vst [vmem:[#allocation2 + $0x30] sm:$0xff] (!%p1072_p11), %v1192_v24  ;;  %694 = vst [vmem:[#allocation2 + $0x70] sm:$0xff] (!%p1072_p11), %v1567_v25 }
 0x13c   : > { %687 = vst [vmem:[#allocation2 + $0x38] sm:$0xff] %v1195_v30  ;;  %695 = vst [vmem:[#allocation2 + $0x78] sm:$0xff] %v1569_v31 }
 0x13d PF: > { %p1073_p12 = scmp.eq.s32.totalorder %s1371_s17, 0 }
 0x13e   : > { %v700_v32 = vld [vmem:[#allocation2] sm:$0xff] (!%p1073_p12)  ;;  %v701_v33 = vld [vmem:[#allocation2 + $0x8] sm:$0xff] (!%p1073_p12)  ;;  %v702_v34 = vld [vmem:[#allocation2 + $0x10] sm:$0xff] (!%p1073_p12) }
 0x13f   : > { %699 = sbr.rel (%p1073_p12) target bundleno = 329 (0x149), region = 78  ;;  %v716_v35 = vadd.f32 (!%p1073_p12), %v1551_v52, %v700_v32  ;;  %v717_v36 = vadd.f32 (!%p1073_p12), %v1555_v58, %v701_v33  ;;  %v718_v37 = vadd.f32 (!%p1073_p12), %v1180_v0, %v702_v34  ;;  %v703_v38 = vld [vmem:[#allocation2 + $0x18] sm:$0xff] (!%p1073_p12)  ;;  %v704_v39 = vld [vmem:[#allocation2 + $0x20] sm:$0xff] (!%p1073_p12)  ;;  %v705_v40 = vld [vmem:[#allocation2 + $0x28] sm:$0xff] (!%p1073_p12) }
 0x140   : > { %v719_v41 = vadd.f32 (!%p1073_p12), %v1183_v6, %v703_v38  ;;  %v720_v42 = vadd.f32 (!%p1073_p12), %v1186_v12, %v704_v39  ;;  %v721_v43 = vadd.f32 (!%p1073_p12), %v1189_v18, %v705_v40  ;;  %v708_v46 = vld [vmem:[#allocation2 + $0x40] sm:$0xff] (!%p1073_p12)  ;;  %v709_v50 = vld [vmem:[#allocation2 + $0x48] sm:$0xff] (!%p1073_p12)  ;;  %v710_v51 = vld [vmem:[#allocation2 + $0x50] sm:$0xff] (!%p1073_p12) }
 0x141   : > { %732 = vst [vmem:[#allocation2] sm:$0xff] (!%p1073_p12), %v716_v35  ;;  %733 = vst [vmem:[#allocation2 + $0x8] sm:$0xff] (!%p1073_p12), %v717_v36  ;;  %v724_v49 = vadd.f32 (!%p1073_p12), %v1553_v53, %v708_v46  ;;  %v711_v52 = vld [vmem:[#allocation2 + $0x58] sm:$0xff] (!%p1073_p12)  ;;  %v725_v54 = vadd.f32 (!%p1073_p12), %v1557_v59, %v709_v50  ;;  %v726_v55 = vadd.f32 (!%p1073_p12), %v1559_v1, %v710_v51  ;;  %v712_v57 = vld [vmem:[#allocation2 + $0x60] sm:$0xff] (!%p1073_p12) }
 0x142   : > { %734 = vst [vmem:[#allocation2 + $0x10] sm:$0xff] (!%p1073_p12), %v718_v37  ;;  %735 = vst [vmem:[#allocation2 + $0x18] sm:$0xff] (!%p1073_p12), %v719_v41  ;;  %v727_v56 = vadd.f32 (!%p1073_p12), %v1561_v7, %v711_v52  ;;  %v713_v58 = vld [vmem:[#allocation2 + $0x68] sm:$0xff] (!%p1073_p12)  ;;  %v728_v53 = vadd.f32 (!%p1073_p12), %v1563_v13, %v712_v57 }
 0x143   : > { %v706_v44 = vld [vmem:[#allocation2 + $0x30] sm:$0xff] (!%p1073_p12)  ;;  %v707_v45 = vld [vmem:[#allocation2 + $0x38] sm:$0xff] (!%p1073_p12)  ;;  %736 = vst [vmem:[#allocation2 + $0x20] sm:$0xff] (!%p1073_p12), %v720_v42  ;;  %737 = vst [vmem:[#allocation2 + $0x28] sm:$0xff] (!%p1073_p12), %v721_v43  ;;  %v729_v61 = vadd.f32 (!%p1073_p12), %v1565_v19, %v713_v58 }
 0x144   : > { %v722_v47 = vadd.f32 (!%p1073_p12), %v1192_v24, %v706_v44  ;;  %v723_v48 = vadd.f32 (!%p1073_p12), %v1195_v30, %v707_v45  ;;  %v714_v60 = vld [vmem:[#allocation2 + $0x70] sm:$0xff] (!%p1073_p12)  ;;  %740 = vst [vmem:[#allocation2 + $0x40] sm:$0xff] (!%p1073_p12), %v724_v49  ;;  %v715_v63 = vld [vmem:[#allocation2 + $0x78] sm:$0xff] (!%p1073_p12)  ;;  %741 = vst [vmem:[#allocation2 + $0x48] sm:$0xff] (!%p1073_p12), %v725_v54 }
 0x145   : > { %v730_v62 = vadd.f32 (!%p1073_p12), %v1567_v25, %v714_v60  ;;  %742 = vst [vmem:[#allocation2 + $0x50] sm:$0xff] (!%p1073_p12), %v726_v55  ;;  %743 = vst [vmem:[#allocation2 + $0x58] sm:$0xff] (!%p1073_p12), %v727_v56  ;;  %v731_v59 = vadd.f32 (!%p1073_p12), %v1569_v31, %v715_v63 }
 0x146   : > { %738 = vst [vmem:[#allocation2 + $0x30] sm:$0xff] %v722_v47  ;;  %739 = vst [vmem:[#allocation2 + $0x38] sm:$0xff] %v723_v48 }
 0x147   : > { %744 = vst [vmem:[#allocation2 + $0x60] sm:$0xff] %v728_v53  ;;  %745 = vst [vmem:[#allocation2 + $0x68] sm:$0xff] %v729_v61 }
 0x148   : > { %746 = vst [vmem:[#allocation2 + $0x70] sm:$0xff] %v730_v62  ;;  %747 = vst [vmem:[#allocation2 + $0x78] sm:$0xff] %v731_v59 }
 0x149 PF: > { %p1074_p13 = scmp.ne.s32.totalorder %s1371_s17, 2 }
 0x14a   : > { %v848_v2 = vld [vmem:[%s1504_s18] sm:$0xff] (!%p1074_p13)  ;;  %v849_v4 = vld [vmem:[%s1504_s18 + $0x8] sm:$0xff] (!%p1074_p13)  ;;  %v850_v8 = vld [vmem:[%s1504_s18 + $0x10] sm:$0xff] (!%p1074_p13) }
 0x14b   : > { %751 = sbr.rel (%p1074_p13) target bundleno = 350 (0x15e), region = 82  ;;  %v752_v0 = vld [vmem:[#allocation2] sm:$0xff] (!%p1074_p13)  ;;  %v753_v1 = vld [vmem:[#allocation2 + $0x8] sm:$0xff] (!%p1074_p13)  ;;  %v851_v9 = vld [vmem:[%s1504_s18 + $0x18] sm:$0xff] (!%p1074_p13) }
 0x14c   : > { %v1112_v3 = vpack.c.bf16 (!%p1074_p13), %v753_v1, %v752_v0  ;;  %v754_v5 = vld [vmem:[#allocation2 + $0x10] sm:$0xff] (!%p1074_p13)  ;;  %v755_v6 = vld [vmem:[#allocation2 + $0x18] sm:$0xff] (!%p1074_p13)  ;;  %v852_v12 = vld [vmem:[%s1504_s18 + $0x20] sm:$0xff] (!%p1074_p13)  ;;  %v864_v18 = vadd.f32 (!%p1074_p13), %v848_v2, %v752_v0  ;;  %v865_v19 = vadd.f32 (!%p1074_p13), %v849_v4, %v753_v1 }
 0x14d   : > { %v1117_v7 = vpack.c.bf16 (!%p1074_p13), %v755_v6, %v754_v5  ;;  %v756_v10 = vld [vmem:[#allocation2 + $0x20] sm:$0xff] (!%p1074_p13)  ;;  %v757_v11 = vld [vmem:[#allocation2 + $0x28] sm:$0xff] (!%p1074_p13)  ;;  %v854_v17 = vld [vmem:[%s1504_s18 + $0x30] sm:$0xff] (!%p1074_p13)  ;;  %v866_v20 = vadd.f32 (!%p1074_p13), %v850_v8, %v754_v5  ;;  %v867_v25 = vadd.f32 (!%p1074_p13), %v851_v9, %v755_v6 }
 0x14e   : > { %1113 = vst [vmem:[%s1509_s10] sm:$0xff] (!%p1074_p13), %v1112_v3   ;;  %v853_v13 = vld [vmem:[%s1504_s18 + $0x28] sm:$0xff] (!%p1074_p13)  ;;  %v1122_v14 = vpack.c.bf16 (!%p1074_p13), %v757_v11, %v756_v10  ;;  %v855_v22 = vld [vmem:[%s1504_s18 + $0x38] sm:$0xff] (!%p1074_p13)  ;;  %v760_v23 = vld [vmem:[#allocation2 + $0x40] sm:$0xff] (!%p1074_p13)  ;;  %v868_v26 = vadd.f32 (!%p1074_p13), %v852_v12, %v756_v10 }
 0x14f   : > { %1149 = vst [vmem:[%s1509_s10 + $0x8] sm:$0xff] (!%p1074_p13), %v1117_v7   ;;  %v761_v24 = vld [vmem:[#allocation2 + $0x48] sm:$0xff] (!%p1074_p13)  ;;  %v869_v27 = vadd.f32 (!%p1074_p13), %v853_v13, %v757_v11  ;;  %v856_v29 = vld [vmem:[%s1504_s18 + $0x40] sm:$0xff] (!%p1074_p13)  ;;  %v762_v31 = vld [vmem:[#allocation2 + $0x50] sm:$0xff] (!%p1074_p13) }
 0x150   : > { %v758_v15 = vld [vmem:[#allocation2 + $0x30] sm:$0xff] (!%p1074_p13)  ;;  %v759_v16 = vld [vmem:[#allocation2 + $0x38] sm:$0xff] (!%p1074_p13)  ;;  %1150 = vst [vmem:[%s1509_s10 + $0x10] sm:$0xff] (!%p1074_p13), %v1122_v14   ;;  %v1132_v28 = vpack.c.bf16 (!%p1074_p13), %v761_v24, %v760_v23  ;;  %v857_v30 = vld [vmem:[%s1504_s18 + $0x48] sm:$0xff] (!%p1074_p13)  ;;  %v872_v34 = vadd.f32 (!%p1074_p13), %v856_v29, %v760_v23 }
 0x151   : > { %v1127_v21 = vpack.c.bf16 (!%p1074_p13), %v759_v16, %v758_v15  ;;  %v870_v32 = vadd.f32 (!%p1074_p13), %v854_v17, %v758_v15  ;;  %v871_v33 = vadd.f32 (!%p1074_p13), %v855_v22, %v759_v16  ;;  %v873_v35 = vadd.f32 (!%p1074_p13), %v857_v30, %v761_v24  ;;  %v763_v36 = vld [vmem:[#allocation2 + $0x58] sm:$0xff] (!%p1074_p13)  ;;  %v858_v37 = vld [vmem:[%s1504_s18 + $0x50] sm:$0xff] (!%p1074_p13)  ;;  %v764_v42 = vld [vmem:[#allocation2 + $0x60] sm:$0xff] (!%p1074_p13) }
 0x152   : > { %v859_v38 = vld [vmem:[%s1504_s18 + $0x58] sm:$0xff]  ;;  %1152 = vst [vmem:[%s1509_s10 + $0x20] sm:$0xff] %v1132_v28   ;;  %v1137_v39 = vpack.c.bf16 %v763_v36, %v762_v31  ;;  %v874_v40 = vadd.f32 %v858_v37, %v762_v31  ;;  %v765_v43 = vld [vmem:[#allocation2 + $0x68] sm:$0xff]  ;;  %v860_v44 = vld [vmem:[%s1504_s18 + $0x60] sm:$0xff] }
 0x153   : > { %1151 = vst [vmem:[%s1509_s10 + $0x18] sm:$0xff] %v1127_v21   ;;  %v875_v41 = vadd.f32 %v859_v38, %v763_v36  ;;  %v1142_v45 = vpack.c.bf16 %v765_v43, %v764_v42  ;;  %v861_v46 = vld [vmem:[%s1504_s18 + $0x68] sm:$0xff]  ;;  %v876_v47 = vadd.f32 %v860_v44, %v764_v42  ;;  %v766_v48 = vld [vmem:[#allocation2 + $0x70] sm:$0xff]  ;;  %v767_v49 = vld [vmem:[#allocation2 + $0x78] sm:$0xff] }
 0x154   : > { %1153 = vst [vmem:[%s1509_s10 + $0x28] sm:$0xff] %v1137_v39   ;;  %v877_v50 = vadd.f32 %v861_v46, %v765_v43  ;;  %v1147_v51 = vpack.c.bf16 %v767_v49, %v766_v48  ;;  %v862_v52 = vld [vmem:[%s1504_s18 + $0x70] sm:$0xff]  ;;  %v863_v54 = vld [vmem:[%s1504_s18 + $0x78] sm:$0xff] }
 0x155   : > { %1154 = vst [vmem:[%s1509_s10 + $0x30] sm:$0xff] %v1142_v45   ;;  %v878_v55 = vadd.f32 %v862_v52, %v766_v48  ;;  %v879_v56 = vadd.f32 %v863_v54, %v767_v49  ;;  %880 = vst [vmem:[%s1515_s14] sm:$0xff] %v864_v18 }
 0x156   : > { %881 = vst [vmem:[%s1515_s14 + $0x8] sm:$0xff] %v865_v19  ;;  %882 = vst [vmem:[%s1515_s14 + $0x10] sm:$0xff] %v866_v20 }
 0x157   : > { %883 = vst [vmem:[%s1515_s14 + $0x18] sm:$0xff] %v867_v25  ;;  %884 = vst [vmem:[%s1515_s14 + $0x20] sm:$0xff] %v868_v26 }
 0x158   : > { %885 = vst [vmem:[%s1515_s14 + $0x28] sm:$0xff] %v869_v27  ;;  %886 = vst [vmem:[%s1515_s14 + $0x30] sm:$0xff] %v870_v32 }
 0x159   : > { %887 = vst [vmem:[%s1515_s14 + $0x38] sm:$0xff] %v871_v33  ;;  %888 = vst [vmem:[%s1515_s14 + $0x40] sm:$0xff] %v872_v34 }
 0x15a   : > { %889 = vst [vmem:[%s1515_s14 + $0x48] sm:$0xff] %v873_v35  ;;  %890 = vst [vmem:[%s1515_s14 + $0x50] sm:$0xff] %v874_v40 }
 0x15b   : > { %891 = vst [vmem:[%s1515_s14 + $0x58] sm:$0xff] %v875_v41  ;;  %892 = vst [vmem:[%s1515_s14 + $0x60] sm:$0xff] %v876_v47 }
 0x15c   : > { %1155 = vst [vmem:[%s1509_s10 + $0x38] sm:$0xff] %v1147_v51   ;;  %893 = vst [vmem:[%s1515_s14 + $0x68] sm:$0xff] %v877_v50 }
 0x15d   : > { %894 = vst [vmem:[%s1515_s14 + $0x70] sm:$0xff] %v878_v55  ;;  %895 = vst [vmem:[%s1515_s14 + $0x78] sm:$0xff] %v879_v56 }
 0x15e PF: > { %s15_s21 = sadd.s32 1, %s1387_s21   ;;  %s1660_s15 = smov %s1367_s16 }
 0x15f   : > { %p12_p0 = scmp.ge.s32.totalorder %s15_s21, 20   ;;  %s1661_s16 = smov %s1465_s28 }
 0x160   : > { %s1662_s17 = smov %s1379_s19  ;;  %s1663_s18 = smov %s1383_s20 }
 0x161   : > { %s1664_s19 = smov %s1667_s22  ;;  %s1665_s20 = smov %s1671_s23 }
 0x162   :  { %14 = sbr.rel (!%p12_p0) target bundleno = 4 (0x4), region = 133 }

// kernel: _run_dense_stack.5
= control target key start
LH: loop header
LB: loop body
LE: loop exit
PB: predicated region body
PF: predicated region fallthrough
CT: control target
= control target key end

     0   :  { %s1873_s0 = inlined_call_operand.vmem [shape: bf16[768,768], index: 0, kind: input, shape index: {}]   ;;  %s1874_s1 = inlined_call_operand.vmem [shape: bf16[768,128], index: 1, kind: input, shape index: {}]   ;;  %s1875_s2 = inlined_call_operand.vmem [shape: f32[768,128], index: 2, kind: input, shape index: {}, may-alias: {2,4}]   ;;  %s1876_s3 = inlined_call_operand.hbm [shape: bf16[768,128], index: 3, kind: output, shape index: {0}]   ;;  %s1877_s4 = inlined_call_operand.vmem [shape: f32[768,128], index: 4, kind: output, shape index: {1}, may-alias: {2,4}]  }
   0x1   :  { %1883 = sst [smem:[#allocation11_spill]] %s1873_s0 }
   0x2   :  { %10 = vsyncpa [#allocation5], 0 }
   0x3   :  { %12 = vsyncpa [#allocation5 + $0x1], 0  ;;  %s1542_s15 = smov 0   ;;  %s1544_s16 = smov 0  }
   0x4   :  { %s1546_s17 = smov 0   ;;  %s1548_s18 = smov 0  }
   0x5   :  { %s1550_s19 = smov 0   ;;  %s1552_s20 = smov 0  }
   0x6   :  { %s1554_s21 = smov 0   ;;  %s1556_s22 = smov 0  }
   0x7   :  { %s1558_s23 = smov 0   ;;  %s1560_s24 = smov 0  }
   0x8 LB: > { %1884 = sst [smem:[#allocation7_spill]] %s1504_s22  ;;  %s1054_s25 = sadd.s32 4294967295, %s1512_s24   ;;  %s1512_s24 = sphi %s1560_s24, %s18_s24   ;;  %s1508_s23 = sphi %s1558_s23, %s1896_s23   ;;  %s1504_s22 = sphi %s1556_s22, %s1895_s22   ;;  %s1500_s21 = sphi %s1554_s21, %s1894_s21   ;;  %s1496_s20 = sphi %s1552_s20, %s1893_s20   ;;  %s1492_s19 = sphi %s1550_s19, %s1901_s19   ;;  %s1488_s18 = sphi %s1548_s18, %s1900_s18   ;;  %s1484_s17 = sphi %s1546_s17, %s1899_s17   ;;  %s1480_s16 = sphi %s1544_s16, %s1898_s16   ;;  %s1476_s15 = sphi %s1542_s15, %s1897_s15  }
   0x9   : > { %1885 = sst [smem:[#allocation8_spill]] %s1508_s23  ;;  %s1055_s26 = sadd.s32 4294967294, %s1512_s24  }
   0xa   : > { %s27_s27 = sadd.s32 1, %s1504_s22  ;;  %s30_s28 = sadd.s32 1, %s1508_s23 }
   0xb   : > { %p28_p0 = scmp.ge.s32.totalorder %s27_s27, 3  ;;  %s39_s29 = sadd.s32 1, %s1492_s19 }
   0xc   : > { %p46_p1 = scmp.ne.s32.totalorder %s1492_s19, %s1488_s18  ;;  %p47_p2 = scmp.eq.s32.totalorder %s1512_s24, 0 }
   0xd   : > { %s1903_s27 = smov (%p28_p0, %s27_s27), 0  ;;  %s1905_s28 = smov (!%p28_p0, %s30_s28), %s1508_s23 }
   0xe   : > { %1886 = sst [smem:[#allocation9_spill]] %s1903_s27  ;;  %s35_s30 = ssub.s32 %s1504_s22, %s1903_s27 }
   0xf   : > { %p1605_p3 = por %p47_p2, %p46_p1  ;;  %p32_p4 = scmp.ge.s32.totalorder %s1905_s28, 6 }
  0x10   : > { %s112_s6 = sadd.s32 1, %s1484_s17  ;;  %p122_p5 = scmp.ne.s32.totalorder %s1484_s17, %s1480_s16 }
  0x11   : > { %p123_p6 = scmp.eq.s32.totalorder %s1054_s25, 17  ;;  %s1907_s28 = smov (%p32_p4, %s1905_s28), 0 }
  0x12   : > { %1888 = sst [smem:[#allocation10_spill]] %s1907_s28  ;;  %p128_p8 = scmp.ne.s32.totalorder %s1480_s16, %s1476_s15 }
  0x13   : > { %p1614_p7 = por %p123_p6, %p122_p5  ;;  %s34_s8 = ssub.s32 %s1508_s23, %s1907_s28 }
  0x14   : > { %p129_p9 = scmp.eq.s32.totalorder %s1055_s26, 17  ;;  %s36_s9 = sor.u32 %s35_s30, %s34_s8 }
  0x15   : > { %p110_p10 = scmp.eq.s32.totalorder %s34_s8, 0  ;;  %p37_p11 = scmp.eq.s32.totalorder %s36_s9, 0 }
  0x16   : > { %p1622_p12 = por %p129_p9, %p128_p8  ;;  %p1057_p13 = scmp.ge.s32.totalorder %s1512_s24, 18 }
  0x17   : > { %s1627_s11 = scalar_select %p110_p10, %s1484_s17, %s112_s6  }
  0x18   : > { %s1630_s12 = scalar_select %p37_p11, %s1492_s19, %s39_s29  }
  0x19   : > { %174 = sbr.rel (%p1057_p13) target bundleno = 50 (0x32), region = 20 }
  0x20   : > { %177 = sbr.rel (!%p1605_p3) target bundleno = 50 (0x32), region = 24  ;;  %s179_s13 = sand.u32 (%p1605_p3), 1, %s1492_s19  }
  0x21   : > { %s1060_s14 = sshll.u32 (%p1605_p3), %s1504_s22, 1  ;;  %s1058_s25 = sshll.u32 (%p1605_p3), %s179_s13, 7 }
  0x22   : > { %s1272_s26 = smul.u32 (%p1605_p3), 96, %s1508_s23  ;;  %s1891_s0 = sld [smem:[#allocation11_spill]] (%p1605_p3) }
  0x23   : > { %s181_s5 = scalar_lea.vmem (%p1605_p3), [#allocation3], %s1058_s25 }
  0x24   : > { %s185_s30 = sadd.s32 (%p1605_p3), %s1272_s26, %s1060_s14 }
  0x25   : > { %s1062_s8 = sshll.u32 (%p1605_p3), %s185_s30, 2 }
  0x28   : > { %s1641_s29 = scalar_lea.vmem %s1891_s0, %s1062_s8 }
  0x29   : > { %v245_v0 = vld [vmem:[%s1641_s29] sm:$0xff]  ;;  %v247_v1 = vld [vmem:[%s1641_s29 + $0x18] sm:$0xff]  ;;  %v249_v2 = vld [vmem:[%s1641_s29 + $0x30] sm:$0xff] }
  0x2a   : > { %246 = vst [vmem:[%s181_s5] sm:$0xff] %v245_v0  ;;  %248 = vst [vmem:[%s181_s5 + $0x8] sm:$0xff] %v247_v1  ;;  %v251_v3 = vld [vmem:[%s1641_s29 + $0x48] sm:$0xff]  ;;  %v253_v4 = vld [vmem:[%s1641_s29 + $0x60] sm:$0xff] }
  0x2b   : > { %250 = vst [vmem:[%s181_s5 + $0x10] sm:$0xff] %v249_v2  ;;  %v255_v5 = vld [vmem:[%s1641_s29 + $0x78] sm:$0xff]  ;;  %252 = vst [vmem:[%s181_s5 + $0x18] sm:$0xff] %v251_v3  ;;  %v257_v6 = vld [vmem:[%s1641_s29 + $0x90] sm:$0xff] }
  0x2c   : > { %254 = vst [vmem:[%s181_s5 + $0x20] sm:$0xff] %v253_v4  ;;  %256 = vst [vmem:[%s181_s5 + $0x28] sm:$0xff] %v255_v5  ;;  %v259_v7 = vld [vmem:[%s1641_s29 + $0xa8] sm:$0xff]  ;;  %v261_v8 = vld [vmem:[%s1641_s29 + $0xc0] sm:$0xff] }
  0x2d   : > { %258 = vst [vmem:[%s181_s5 + $0x30] sm:$0xff] %v257_v6  ;;  %260 = vst [vmem:[%s181_s5 + $0x38] sm:$0xff] %v259_v7  ;;  %v263_v9 = vld [vmem:[%s1641_s29 + $0xd8] sm:$0xff]  ;;  %v265_v10 = vld [vmem:[%s1641_s29 + $0xf0] sm:$0xff] }
  0x2e   : > { %262 = vst [vmem:[%s181_s5 + $0x40] sm:$0xff] %v261_v8  ;;  %v267_v11 = vld [vmem:[%s1641_s29 + $0x108] sm:$0xff]  ;;  %264 = vst [vmem:[%s181_s5 + $0x48] sm:$0xff] %v263_v9  ;;  %v269_v12 = vld [vmem:[%s1641_s29 + $0x120] sm:$0xff] }
  0x2f   : > { %266 = vst [vmem:[%s181_s5 + $0x50] sm:$0xff] %v265_v10  ;;  %268 = vst [vmem:[%s181_s5 + $0x58] sm:$0xff] %v267_v11  ;;  %v271_v13 = vld [vmem:[%s1641_s29 + $0x138] sm:$0xff]  ;;  %v273_v14 = vld [vmem:[%s1641_s29 + $0x150] sm:$0xff] }
  0x30   : > { %270 = vst [vmem:[%s181_s5 + $0x60] sm:$0xff] %v269_v12  ;;  %272 = vst [vmem:[%s181_s5 + $0x68] sm:$0xff] %v271_v13  ;;  %v275_v15 = vld [vmem:[%s1641_s29 + $0x168] sm:$0xff] }
  0x31   : > { %274 = vst [vmem:[%s181_s5 + $0x70] sm:$0xff] %v273_v14  ;;  %276 = vst [vmem:[%s181_s5 + $0x78] sm:$0xff] %v275_v15 }
  0x32 PF: > { %p1063_p0 = scmp.ge.s32.totalorder %s1512_s24, 1  ;;  %p290_p1 = scmp.lt.s32.totalorder %s1512_s24, 19 }
  0x34   : > { %p291_p2 = pnand %p1063_p0, %p290_p1 }
  0x35   : > { %s1882_s13 = sand.u32 (!%p291_p2), 1, %s1480_s16   ;;  %s1066_s14 = sshll.u32 (!%p291_p2), %s1500_s21, 4 }
  0x36   : > { %294 = sbr.rel (%p291_p2) target bundleno = 393 (0x189), region = 66  ;;  %s1665_s25 = sshll.u32 (!%p291_p2), %s1882_s13, 6 }
  0x37   : > { %p335_p3 = scmp.lt.s32.totalorder (!%p291_p2), %s1066_s14, 95  ;;  %s1070_s26 = sshll.u32 (!%p291_p2), %s1496_s20, 8 }
  0x38   : > { %s349_s30 = sshra.s32 (!%p291_p2), %s1070_s26, 3  ;;  %s297_s0 = sand.u32 (!%p291_p2), 1, %s1488_s18  }
  0x39   : > { %s1071_s9 = sshll.u32 (!%p291_p2), %s349_s30, 2  ;;  %s1064_s22 = sshll.u32 (!%p291_p2), %s297_s0, 7 }
  0x3a   : > { %s1681_s13 = scalar_lea.vmem (!%p291_p2), %s1874_s1, %s1071_s9  ;;  %s1695_s23 = scalar_lea.vmem (!%p291_p2), [#allocation3], %s1064_s22 }
  0x3b   : > { %v1362_v16 = vld [vmem:[%s1681_s13 + $0x40] sm:$0xff] (!%p291_p2)   ;;  %v1364_v18 = vld [vmem:[%s1681_s13 + $0x48] sm:$0xff] (!%p291_p2)   ;;  %v1366_v20 = vld [vmem:[%s1681_s13 + $0x50] sm:$0xff] (!%p291_p2)   ;;  %s1739_s18 = scalar_lea.vmem (!%p291_p2), [#allocation4], %s1665_s25  ;;  %p1104_p4 = scmp.ne.s32.totalorder (!%p291_p2), %s1496_s20, 0 }
  0x3c   : > { %v1363_v17 = vld [vmem:[%s1681_s13] sm:$0xff] (!%p291_p2)   ;;  %1192 = vmatprep.subr.bf16.mxu0 (!%p291_p2), %v1362_v16  ;;  %1256 = vmatprep.subr.bf16.mxu1 (!%p291_p2), %v1362_v16  ;;  %v1365_v19 = vld [vmem:[%s1681_s13 + $0x8] sm:$0xff] (!%p291_p2)   ;;  %v1367_v21 = vld [vmem:[%s1681_s13 + $0x10] sm:$0xff] (!%p291_p2)  }
  0x3d   : > { %s1909_s14 = smov (!%p335_p3, %s1066_s14), 95  ;;  %1193 = vmatpush3.bf16.msra.mxu0 %v1363_v17  ;;  %1264 = vmatpush3.bf16.msra.mxu1 %v1363_v17  ;;  %v1368_v22 = vld [vmem:[%s1681_s13 + $0x58] sm:$0xff]   ;;  %v1370_v24 = vld [vmem:[%s1681_s13 + $0x60] sm:$0xff]   ;;  %v1372_v26 = vld [vmem:[%s1681_s13 + $0x68] sm:$0xff]  }
  0x3e   : > { %s1067_s8 = sshll.u32 %s1909_s14, 3  ;;  %1194 = vmatprep.subr.bf16.mxu0 %v1364_v18  ;;  %1257 = vmatprep.subr.bf16.mxu1 %v1364_v18  ;;  %v1369_v23 = vld [vmem:[%s1681_s13 + $0x18] sm:$0xff]   ;;  %v1371_v25 = vld [vmem:[%s1681_s13 + $0x20] sm:$0xff]   ;;  %v1373_v29 = vld [vmem:[%s1681_s13 + $0x28] sm:$0xff]  }
  0x3f   : > { %s1671_s5 = scalar_lea.vmem %s1875_s2, %s1067_s8  ;;  %s1676_s27 = scalar_lea.vmem %s1877_s4, %s1067_s8  ;;  %v1380_v27 = vld [vmem:[%s1695_s23 + $0x4] ss:$8 sps:$4 sm:$0xff]   ;;  %v1374_v30 = vld [vmem:[%s1681_s13 + $0x70] sm:$0xff]   ;;  %v1376_v32 = vld [vmem:[%s1681_s13 + $0x78] sm:$0xff]  }
  0x40   : > { %v1383_v28 = vld [vmem:[%s1695_s23 + $0x44] ss:$8 sps:$4 sm:$0xff]   ;;  %609 = vmatprep.mubr.bf16.mxu0 %v1380_v27  ;;  %v1375_v31 = vld [vmem:[%s1681_s13 + $0x30] sm:$0xff]   ;;  %v1377_v33 = vld [vmem:[%s1681_s13 + $0x38] sm:$0xff]  }
  0x41   : > { %1195 = vmatpush3.bf16.msra.mxu0 %v1365_v19  ;;  %1265 = vmatpush3.bf16.msra.mxu1 %v1365_v19  ;;  %v1378_v34 = vld [vmem:[%s1695_s23] ss:$8 sps:$4 sm:$0xff]   ;;  %v1384_v36 = vld [vmem:[%s1695_s23 + $0x14] ss:$8 sps:$4 sm:$0xff]   ;;  %v1388_v38 = vld [vmem:[%s1695_s23 + $0x10] ss:$8 sps:$4 sm:$0xff]  }
  0x42   : > { %1196 = vmatprep.subr.bf16.mxu0 %v1366_v20  ;;  %1258 = vmatprep.subr.bf16.mxu1 %v1366_v20  ;;  %v1381_v35 = vld [vmem:[%s1695_s23 + $0x40] ss:$8 sps:$4 sm:$0xff]   ;;  %v1386_v37 = vld [vmem:[%s1695_s23 + $0x54] ss:$8 sps:$4 sm:$0xff]   ;;  %v1389_v39 = vld [vmem:[%s1695_s23 + $0x50] ss:$8 sps:$4 sm:$0xff]  }
  0x43   : > { %641 = vmatprep.mubr.bf16.mxu1 %v1383_v28  ;;  %v1390_v40 = vld [vmem:[%s1695_s23 + $0x24] ss:$8 sps:$4 sm:$0xff]   ;;  %v1394_v42 = vld [vmem:[%s1695_s23 + $0x20] ss:$8 sps:$4 sm:$0xff]   ;;  %v1396_v44 = vld [vmem:[%s1695_s23 + $0x34] ss:$8 sps:$4 sm:$0xff]  }
  0x44   : > { %v1392_v41 = vld [vmem:[%s1695_s23 + $0x64] ss:$8 sps:$4 sm:$0xff]   ;;  %v1395_v43 = vld [vmem:[%s1695_s23 + $0x60] ss:$8 sps:$4 sm:$0xff]   ;;  %v1398_v45 = vld [vmem:[%s1695_s23 + $0x74] ss:$8 sps:$4 sm:$0xff]  }
  0x45   : > { %1197 = vmatpush3.bf16.msra.mxu0 %v1367_v21  ;;  %1266 = vmatpush3.bf16.msra.mxu1 %v1367_v21  ;;  %v1400_v46 = vld [vmem:[%s1695_s23 + $0x30] ss:$8 sps:$4 sm:$0xff]  }
  0x46   : > { %1198 = vmatprep.subr.bf16.mxu0 %v1368_v22  ;;  %1259 = vmatprep.subr.bf16.mxu1 %v1368_v22  ;;  %v1401_v47 = vld [vmem:[%s1695_s23 + $0x70] ss:$8 sps:$4 sm:$0xff]  }
  0x49   : > { %1199 = vmatpush3.bf16.msra.mxu0 %v1369_v23  ;;  %1267 = vmatpush3.bf16.msra.mxu1 %v1369_v23 }
  0x4a   : > { %1200 = vmatprep.subr.bf16.mxu0 %v1370_v24  ;;  %1260 = vmatprep.subr.bf16.mxu1 %v1370_v24 }
  0x4d   : > { %1201 = vmatpush3.bf16.msra.mxu0 %v1371_v25  ;;  %1268 = vmatpush3.bf16.msra.mxu1 %v1371_v25 }
  0x4e   : > { %1202 = vmatprep.subr.bf16.mxu0 %v1372_v26  ;;  %1261 = vmatprep.subr.bf16.mxu1 %v1372_v26 }
  0x51   : > { %1203 = vmatpush3.bf16.msra.mxu0 %v1373_v29  ;;  %1269 = vmatpush3.bf16.msra.mxu1 %v1373_v29 }
  0x52   : > { %1204 = vmatprep.subr.bf16.mxu0 %v1374_v30  ;;  %1262 = vmatprep.subr.bf16.mxu1 %v1374_v30 }
  0x55   : > { %1205 = vmatpush3.bf16.msra.mxu0 %v1375_v31  ;;  %1270 = vmatpush3.bf16.msra.mxu1 %v1375_v31 }
  0x56   : > { %1206 = vmatprep.subr.bf16.mxu0 %v1376_v32  ;;  %1263 = vmatprep.subr.bf16.mxu1 %v1376_v32 }
  0x59   : > { %1207 = vmatpush3.bf16.msra.mxu0 %v1377_v33  ;;  %1271 = vmatpush3.bf16.msra.mxu1 %v1377_v33 }
  0x5c   : > { %610 = vmatmul.mubr.bf16.vlgmr.msra.gmra.mrb[0].mxu0 %v1378_v34  ;;  %642 = vmatmul.mubr.bf16.vlgmr.msra.gmra.mrb[0].mxu1 %v1381_v35 }
  0x5d   : > { %617 = vmatprep.mubr.bf16.mxu0 %v1384_v36  ;;  %649 = vmatprep.mubr.bf16.mxu1 %v1386_v37 }
  0x64   : > { %618 = vmatmul.mubr.bf16.gmra.mrb[4].mxu0 %v1388_v38  ;;  %650 = vmatmul.mubr.bf16.gmra.mrb[4].mxu1 %v1389_v39 }
  0x65   : > { %625 = vmatprep.mubr.bf16.mxu0 %v1390_v40  ;;  %657 = vmatprep.mubr.bf16.mxu1 %v1392_v41 }
  0x6c   : > { %626 = vmatmul.mubr.bf16.gmra.mrb[8].mxu0 %v1394_v42  ;;  %658 = vmatmul.mubr.bf16.gmra.mrb[8].mxu1 %v1395_v43 }
  0x6d   : > { %633 = vmatprep.mubr.bf16.mxu0 %v1396_v44  ;;  %665 = vmatprep.mubr.bf16.mxu1 %v1398_v45 }
  0x74   : > { %634 = vmatmul.mubr.bf16.gmra.mrb[12].mxu0 %v1400_v46  ;;  %666 = vmatmul.mubr.bf16.gmra.mrb[12].mxu1 %v1401_v47 }
 0x12f   : > { %v1208_v48 = vpop.f32.mrb[0].mxu0  ;;  %v1232_v49 = vpop.f32.mrb[0].mxu1 }
 0x130   : > { %v1209_v50 = vpop.f32.mrb[1].mxu0  ;;  %v1233_v51 = vpop.f32.mrb[1].mxu1 }
 0x131   : > { %v1718_v52 = vadd.f32 %v1209_v50, %v1208_v48  ;;  %v1720_v53 = vadd.f32 %v1233_v51, %v1232_v49  ;;  %v1211_v54 = vpop.f32.mrb[2].mxu0  ;;  %v1235_v55 = vpop.f32.mrb[2].mxu1 }
 0x132   : > { %v1212_v56 = vpop.f32.mrb[3].mxu0  ;;  %v1236_v57 = vpop.f32.mrb[3].mxu1 }
 0x133   : > { %v1722_v58 = vadd.f32 %v1212_v56, %v1211_v54  ;;  %v1724_v59 = vadd.f32 %v1236_v57, %v1235_v55  ;;  %678 = vst [vmem:[#allocation2] sm:$0xff] (!%p1104_p4), %v1718_v52  ;;  %686 = vst [vmem:[#allocation2 + $0x40] sm:$0xff] (!%p1104_p4), %v1720_v53 }
 0x135   : > { %679 = vst [vmem:[#allocation2 + $0x8] sm:$0xff] (!%p1104_p4), %v1722_v58  ;;  %687 = vst [vmem:[#allocation2 + $0x48] sm:$0xff] (!%p1104_p4), %v1724_v59 }
 0x137   : > { %v1214_v60 = vpop.f32.mrb[4].mxu0  ;;  %v1238_v61 = vpop.f32.mrb[4].mxu1 }
 0x138   : > { %v1215_v62 = vpop.f32.mrb[5].mxu0  ;;  %v1239_v63 = vpop.f32.mrb[5].mxu1 }
 0x139   : > { %v1216_v0 = vadd.f32 %v1215_v62, %v1214_v60  ;;  %v1726_v1 = vadd.f32 %v1239_v63, %v1238_v61  ;;  %v1217_v2 = vpop.f32.mrb[6].mxu0  ;;  %v1241_v3 = vpop.f32.mrb[6].mxu1 }
 0x13a   : > { %v1218_v4 = vpop.f32.mrb[7].mxu0  ;;  %v1242_v5 = vpop.f32.mrb[7].mxu1 }
 0x13b   : > { %v1219_v6 = vadd.f32 %v1218_v4, %v1217_v2  ;;  %v1728_v7 = vadd.f32 %v1242_v5, %v1241_v3  ;;  %680 = vst [vmem:[#allocation2 + $0x10] sm:$0xff] (!%p1104_p4), %v1216_v0  ;;  %688 = vst [vmem:[#allocation2 + $0x50] sm:$0xff] (!%p1104_p4), %v1726_v1 }
 0x13d   : > { %681 = vst [vmem:[#allocation2 + $0x18] sm:$0xff] (!%p1104_p4), %v1219_v6  ;;  %689 = vst [vmem:[#allocation2 + $0x58] sm:$0xff] (!%p1104_p4), %v1728_v7 }
 0x13f   : > { %v1220_v8 = vpop.f32.mrb[8].mxu0  ;;  %v1244_v9 = vpop.f32.mrb[8].mxu1 }
 0x140   : > { %v1221_v10 = vpop.f32.mrb[9].mxu0  ;;  %v1245_v11 = vpop.f32.mrb[9].mxu1 }
 0x141   : > { %v1222_v12 = vadd.f32 %v1221_v10, %v1220_v8  ;;  %v1730_v13 = vadd.f32 %v1245_v11, %v1244_v9  ;;  %v1223_v14 = vpop.f32.mrb[10].mxu0  ;;  %v1247_v15 = vpop.f32.mrb[10].mxu1 }
 0x142   : > { %v1224_v16 = vpop.f32.mrb[11].mxu0  ;;  %v1248_v17 = vpop.f32.mrb[11].mxu1 }
 0x143   : > { %v1225_v18 = vadd.f32 %v1224_v16, %v1223_v14  ;;  %v1732_v19 = vadd.f32 %v1248_v17, %v1247_v15  ;;  %682 = vst [vmem:[#allocation2 + $0x20] sm:$0xff] (!%p1104_p4), %v1222_v12  ;;  %690 = vst [vmem:[#allocation2 + $0x60] sm:$0xff] (!%p1104_p4), %v1730_v13 }
 0x145   : > { %677 = sbr.rel (%p1104_p4) target bundleno = 334 (0x14e), region = 74  ;;  %683 = vst [vmem:[#allocation2 + $0x28] sm:$0xff] (!%p1104_p4), %v1225_v18  ;;  %691 = vst [vmem:[#allocation2 + $0x68] sm:$0xff] (!%p1104_p4), %v1732_v19 }
 0x147   : > { %v1226_v20 = vpop.f32.mrb[12].mxu0  ;;  %v1250_v21 = vpop.f32.mrb[12].mxu1 }
 0x148   : > { %v1227_v22 = vpop.f32.mrb[13].mxu0  ;;  %v1251_v23 = vpop.f32.mrb[13].mxu1 }
 0x149   : > { %v1228_v24 = vadd.f32 %v1227_v22, %v1226_v20  ;;  %v1734_v25 = vadd.f32 %v1251_v23, %v1250_v21  ;;  %v1229_v26 = vpop.f32.mrb[14].mxu0  ;;  %v1253_v27 = vpop.f32.mrb[14].mxu1 }
 0x14a   : > { %v1230_v28 = vpop.f32.mrb[15].mxu0  ;;  %v1254_v29 = vpop.f32.mrb[15].mxu1 }
 0x14b   : > { %v1231_v30 = vadd.f32 %v1230_v28, %v1229_v26  ;;  %v1736_v31 = vadd.f32 %v1254_v29, %v1253_v27  ;;  %684 = vst [vmem:[#allocation2 + $0x30] sm:$0xff] (!%p1104_p4), %v1228_v24  ;;  %692 = vst [vmem:[#allocation2 + $0x70] sm:$0xff] (!%p1104_p4), %v1734_v25 }
 0x14d   : > { %685 = vst [vmem:[#allocation2 + $0x38] sm:$0xff] %v1231_v30  ;;  %693 = vst [vmem:[#allocation2 + $0x78] sm:$0xff] %v1736_v31 }
 0x14e PF: > { %p1105_p5 = scmp.eq.s32.totalorder %s1496_s20, 0 }
 0x14f   : > { %v698_v32 = vld [vmem:[#allocation2] sm:$0xff] (!%p1105_p5)  ;;  %v699_v33 = vld [vmem:[#allocation2 + $0x8] sm:$0xff] (!%p1105_p5)  ;;  %v700_v34 = vld [vmem:[#allocation2 + $0x10] sm:$0xff] (!%p1105_p5) }
 0x150   : > { %697 = sbr.rel (%p1105_p5) target bundleno = 346 (0x15a), region = 78  ;;  %v714_v35 = vadd.f32 (!%p1105_p5), %v1718_v52, %v698_v32  ;;  %v715_v36 = vadd.f32 (!%p1105_p5), %v1722_v58, %v699_v33  ;;  %v716_v37 = vadd.f32 (!%p1105_p5), %v1216_v0, %v700_v34  ;;  %v701_v38 = vld [vmem:[#allocation2 + $0x18] sm:$0xff] (!%p1105_p5)  ;;  %v702_v39 = vld [vmem:[#allocation2 + $0x20] sm:$0xff] (!%p1105_p5)  ;;  %v703_v40 = vld [vmem:[#allocation2 + $0x28] sm:$0xff] (!%p1105_p5) }
 0x151   : > { %v717_v41 = vadd.f32 (!%p1105_p5), %v1219_v6, %v701_v38  ;;  %v718_v42 = vadd.f32 (!%p1105_p5), %v1222_v12, %v702_v39  ;;  %v719_v43 = vadd.f32 (!%p1105_p5), %v1225_v18, %v703_v40  ;;  %v706_v46 = vld [vmem:[#allocation2 + $0x40] sm:$0xff] (!%p1105_p5)  ;;  %v707_v50 = vld [vmem:[#allocation2 + $0x48] sm:$0xff] (!%p1105_p5)  ;;  %v708_v51 = vld [vmem:[#allocation2 + $0x50] sm:$0xff] (!%p1105_p5) }
 0x152   : > { %730 = vst [vmem:[#allocation2] sm:$0xff] (!%p1105_p5), %v714_v35  ;;  %731 = vst [vmem:[#allocation2 + $0x8] sm:$0xff] (!%p1105_p5), %v715_v36  ;;  %v722_v49 = vadd.f32 (!%p1105_p5), %v1720_v53, %v706_v46  ;;  %v709_v52 = vld [vmem:[#allocation2 + $0x58] sm:$0xff] (!%p1105_p5)  ;;  %v723_v54 = vadd.f32 (!%p1105_p5), %v1724_v59, %v707_v50  ;;  %v724_v55 = vadd.f32 (!%p1105_p5), %v1726_v1, %v708_v51  ;;  %v710_v57 = vld [vmem:[#allocation2 + $0x60] sm:$0xff] (!%p1105_p5) }
 0x153   : > { %732 = vst [vmem:[#allocation2 + $0x10] sm:$0xff] (!%p1105_p5), %v716_v37  ;;  %733 = vst [vmem:[#allocation2 + $0x18] sm:$0xff] (!%p1105_p5), %v717_v41  ;;  %v725_v56 = vadd.f32 (!%p1105_p5), %v1728_v7, %v709_v52  ;;  %v711_v58 = vld [vmem:[#allocation2 + $0x68] sm:$0xff] (!%p1105_p5)  ;;  %v726_v53 = vadd.f32 (!%p1105_p5), %v1730_v13, %v710_v57 }
 0x154   : > { %v704_v44 = vld [vmem:[#allocation2 + $0x30] sm:$0xff] (!%p1105_p5)  ;;  %v705_v45 = vld [vmem:[#allocation2 + $0x38] sm:$0xff] (!%p1105_p5)  ;;  %734 = vst [vmem:[#allocation2 + $0x20] sm:$0xff] (!%p1105_p5), %v718_v42  ;;  %735 = vst [vmem:[#allocation2 + $0x28] sm:$0xff] (!%p1105_p5), %v719_v43  ;;  %v727_v61 = vadd.f32 (!%p1105_p5), %v1732_v19, %v711_v58 }
 0x155   : > { %v720_v47 = vadd.f32 (!%p1105_p5), %v1228_v24, %v704_v44  ;;  %v721_v48 = vadd.f32 (!%p1105_p5), %v1231_v30, %v705_v45  ;;  %v712_v60 = vld [vmem:[#allocation2 + $0x70] sm:$0xff] (!%p1105_p5)  ;;  %738 = vst [vmem:[#allocation2 + $0x40] sm:$0xff] (!%p1105_p5), %v722_v49  ;;  %v713_v63 = vld [vmem:[#allocation2 + $0x78] sm:$0xff] (!%p1105_p5)  ;;  %739 = vst [vmem:[#allocation2 + $0x48] sm:$0xff] (!%p1105_p5), %v723_v54 }
 0x156   : > { %v728_v62 = vadd.f32 (!%p1105_p5), %v1734_v25, %v712_v60  ;;  %740 = vst [vmem:[#allocation2 + $0x50] sm:$0xff] (!%p1105_p5), %v724_v55  ;;  %741 = vst [vmem:[#allocation2 + $0x58] sm:$0xff] (!%p1105_p5), %v725_v56  ;;  %v729_v59 = vadd.f32 (!%p1105_p5), %v1736_v31, %v713_v63 }
 0x157   : > { %736 = vst [vmem:[#allocation2 + $0x30] sm:$0xff] %v720_v47  ;;  %737 = vst [vmem:[#allocation2 + $0x38] sm:$0xff] %v721_v48 }
 0x158   : > { %742 = vst [vmem:[#allocation2 + $0x60] sm:$0xff] %v726_v53  ;;  %743 = vst [vmem:[#allocation2 + $0x68] sm:$0xff] %v727_v61 }
 0x159   : > { %744 = vst [vmem:[#allocation2 + $0x70] sm:$0xff] %v728_v62  ;;  %745 = vst [vmem:[#allocation2 + $0x78] sm:$0xff] %v729_v59 }
 0x15a PF: > { %p1106_p6 = scmp.ne.s32.totalorder %s1496_s20, 2 }
 0x15b   : > { %v846_v2 = vld [vmem:[%s1671_s5] sm:$0xff] (!%p1106_p6)  ;;  %v847_v4 = vld [vmem:[%s1671_s5 + $0x8] sm:$0xff] (!%p1106_p6)  ;;  %v848_v10 = vld [vmem:[%s1671_s5 + $0x10] sm:$0xff] (!%p1106_p6) }
 0x15c   : > { %749 = sbr.rel (%p1106_p6) target bundleno = 367 (0x16f), region = 82  ;;  %v750_v0 = vld [vmem:[#allocation2] sm:$0xff] (!%p1106_p6)  ;;  %v751_v1 = vld [vmem:[#allocation2 + $0x8] sm:$0xff] (!%p1106_p6)  ;;  %v849_v11 = vld [vmem:[%s1671_s5 + $0x18] sm:$0xff] (!%p1106_p6) }
 0x15d   : > { %v1148_v3 = vpack.c.bf16 (!%p1106_p6), %v751_v1, %v750_v0  ;;  %v862_v5 = vadd.f32 (!%p1106_p6), %v846_v2, %v750_v0  ;;  %v752_v6 = vld [vmem:[#allocation2 + $0x10] sm:$0xff] (!%p1106_p6)  ;;  %v753_v7 = vld [vmem:[#allocation2 + $0x18] sm:$0xff] (!%p1106_p6)  ;;  %v863_v8 = vadd.f32 (!%p1106_p6), %v847_v4, %v751_v1  ;;  %v850_v16 = vld [vmem:[%s1671_s5 + $0x20] sm:$0xff] (!%p1106_p6) }
 0x15e   : > { %v1153_v9 = vpack.c.bf16 (!%p1106_p6), %v753_v7, %v752_v6  ;;  %v754_v12 = vld [vmem:[#allocation2 + $0x20] sm:$0xff] (!%p1106_p6)  ;;  %v864_v13 = vadd.f32 (!%p1106_p6), %v848_v10, %v752_v6  ;;  %v865_v14 = vadd.f32 (!%p1106_p6), %v849_v11, %v753_v7  ;;  %v755_v15 = vld [vmem:[#allocation2 + $0x28] sm:$0xff] (!%p1106_p6)  ;;  %v852_v24 = vld [vmem:[%s1671_s5 + $0x30] sm:$0xff] (!%p1106_p6) }
 0x15f   : > { %1149 = vst [vmem:[%s1739_s18] sm:$0xff] (!%p1106_p6), %v1148_v3   ;;  %v851_v17 = vld [vmem:[%s1671_s5 + $0x28] sm:$0xff] (!%p1106_p6)  ;;  %v878_v18 = vmul.f32 (!%p1106_p6), 0.25, %v862_v5  ;;  %v1158_v19 = vpack.c.bf16 (!%p1106_p6), %v755_v15, %v754_v12  ;;  %v866_v20 = vadd.f32 (!%p1106_p6), %v850_v16, %v754_v12  ;;  %v879_v25 = vmul.f32 (!%p1106_p6), 0.25, %v863_v8  ;;  %v853_v28 = vld [vmem:[%s1671_s5 + $0x38] sm:$0xff] (!%p1106_p6)  ;;  %v758_v30 = vld [vmem:[#allocation2 + $0x40] sm:$0xff] (!%p1106_p6) }
 0x160   : > { %1185 = vst [vmem:[%s1739_s18 + $0x8] sm:$0xff] (!%p1106_p6), %v1153_v9   ;;  %v867_v21 = vadd.f32 (!%p1106_p6), %v851_v17, %v755_v15  ;;  %v880_v26 = vmul.f32 (!%p1106_p6), 0.25, %v864_v13  ;;  %v759_v31 = vld [vmem:[#allocation2 + $0x48] sm:$0xff] (!%p1106_p6)  ;;  %v881_v32 = vmul.f32 (!%p1106_p6), 0.25, %v865_v14  ;;  %v854_v36 = vld [vmem:[%s1671_s5 + $0x40] sm:$0xff] (!%p1106_p6)  ;;  %v760_v38 = vld [vmem:[#allocation2 + $0x50] sm:$0xff] (!%p1106_p6) }
 0x161   : > { %v756_v22 = vld [vmem:[#allocation2 + $0x30] sm:$0xff] (!%p1106_p6)  ;;  %v757_v23 = vld [vmem:[#allocation2 + $0x38] sm:$0xff] (!%p1106_p6)  ;;  %1186 = vst [vmem:[%s1739_s18 + $0x10] sm:$0xff] (!%p1106_p6), %v1158_v19   ;;  %v882_v33 = vmul.f32 (!%p1106_p6), 0.25, %v866_v20  ;;  %v1168_v35 = vpack.c.bf16 (!%p1106_p6), %v759_v31, %v758_v30  ;;  %v855_v37 = vld [vmem:[%s1671_s5 + $0x48] sm:$0xff] (!%p1106_p6)  ;;  %v870_v41 = vadd.f32 (!%p1106_p6), %v854_v36, %v758_v30 }
 0x162   : > { %v1163_v27 = vpack.c.bf16 (!%p1106_p6), %v757_v23, %v756_v22  ;;  %v868_v29 = vadd.f32 (!%p1106_p6), %v852_v24, %v756_v22  ;;  %v869_v34 = vadd.f32 (!%p1106_p6), %v853_v28, %v757_v23  ;;  %v883_v39 = vmul.f32 (!%p1106_p6), 0.25, %v867_v21  ;;  %v761_v43 = vld [vmem:[#allocation2 + $0x58] sm:$0xff] (!%p1106_p6)  ;;  %v856_v44 = vld [vmem:[%s1671_s5 + $0x50] sm:$0xff] (!%p1106_p6)  ;;  %v762_v50 = vld [vmem:[#allocation2 + $0x60] sm:$0xff] (!%p1106_p6) }
 0x163   : > { %v871_v42 = vadd.f32 %v855_v37, %v759_v31  ;;  %v857_v45 = vld [vmem:[%s1671_s5 + $0x58] sm:$0xff]  ;;  %1188 = vst [vmem:[%s1739_s18 + $0x20] sm:$0xff] %v1168_v35   ;;  %v1173_v47 = vpack.c.bf16 %v761_v43, %v760_v38  ;;  %v872_v48 = vadd.f32 %v856_v44, %v760_v38  ;;  %v763_v51 = vld [vmem:[#allocation2 + $0x68] sm:$0xff]  ;;  %v858_v52 = vld [vmem:[%s1671_s5 + $0x60] sm:$0xff]  ;;  %v886_v54 = vmul.f32 0.25, %v870_v41 }
 0x164   : > { %1187 = vst [vmem:[%s1739_s18 + $0x18] sm:$0xff] %v1163_v27   ;;  %v884_v40 = vmul.f32 0.25, %v868_v29  ;;  %v885_v46 = vmul.f32 0.25, %v869_v34  ;;  %v873_v49 = vadd.f32 %v857_v45, %v761_v43  ;;  %v1178_v56 = vpack.c.bf16 %v763_v51, %v762_v50  ;;  %v859_v57 = vld [vmem:[%s1671_s5 + $0x68] sm:$0xff]  ;;  %v764_v60 = vld [vmem:[#allocation2 + $0x70] sm:$0xff]  ;;  %v765_v53 = vld [vmem:[#allocation2 + $0x78] sm:$0xff] }
 0x165   : > { %v887_v55 = vmul.f32 0.25, %v871_v42  ;;  %v874_v58 = vadd.f32 %v858_v52, %v762_v50  ;;  %1189 = vst [vmem:[%s1739_s18 + $0x28] sm:$0xff] %v1173_v47   ;;  %v888_v61 = vmul.f32 0.25, %v872_v48  ;;  %v875_v63 = vadd.f32 %v859_v57, %v763_v51  ;;  %v860_v0 = vld [vmem:[%s1671_s5 + $0x70] sm:$0xff]  ;;  %v861_v1 = vld [vmem:[%s1671_s5 + $0x78] sm:$0xff] }
 0x166   : > { %v889_v62 = vmul.f32 0.25, %v873_v49  ;;  %v1183_v59 = vpack.c.bf16 %v765_v53, %v764_v60  ;;  %1190 = vst [vmem:[%s1739_s18 + $0x30] sm:$0xff] %v1178_v56   ;;  %v876_v3 = vadd.f32 %v860_v0, %v764_v60  ;;  %v877_v4 = vadd.f32 %v861_v1, %v765_v53  ;;  %894 = vst [vmem:[%s1676_s27] sm:$0xff] %v878_v18 }
 0x167   : > { %v890_v2 = vmul.f32 0.25, %v874_v58  ;;  %895 = vst [vmem:[%s1676_s27 + $0x8] sm:$0xff] %v879_v25  ;;  %896 = vst [vmem:[%s1676_s27 + $0x10] sm:$0xff] %v880_v26  ;;  %v891_v5 = vmul.f32 0.25, %v875_v63 }
 0x168   : > { %897 = vst [vmem:[%s1676_s27 + $0x18] sm:$0xff] %v881_v32  ;;  %898 = vst [vmem:[%s1676_s27 + $0x20] sm:$0xff] %v882_v33  ;;  %v892_v6 = vmul.f32 0.25, %v876_v3  ;;  %v893_v7 = vmul.f32 0.25, %v877_v4 }
 0x169   : > { %899 = vst [vmem:[%s1676_s27 + $0x28] sm:$0xff] %v883_v39  ;;  %900 = vst [vmem:[%s1676_s27 + $0x30] sm:$0xff] %v884_v40 }
 0x16a   : > { %901 = vst [vmem:[%s1676_s27 + $0x38] sm:$0xff] %v885_v46  ;;  %902 = vst [vmem:[%s1676_s27 + $0x40] sm:$0xff] %v886_v54 }
 0x16b   : > { %903 = vst [vmem:[%s1676_s27 + $0x48] sm:$0xff] %v887_v55  ;;  %1191 = vst [vmem:[%s1739_s18 + $0x38] sm:$0xff] %v1183_v59  }
 0x16c   : > { %904 = vst [vmem:[%s1676_s27 + $0x50] sm:$0xff] %v888_v61  ;;  %905 = vst [vmem:[%s1676_s27 + $0x58] sm:$0xff] %v889_v62 }
 0x16d   : > { %906 = vst [vmem:[%s1676_s27 + $0x60] sm:$0xff] %v890_v2  ;;  %907 = vst [vmem:[%s1676_s27 + $0x68] sm:$0xff] %v891_v5 }
 0x16e   : > { %908 = vst [vmem:[%s1676_s27 + $0x70] sm:$0xff] %v892_v6  ;;  %909 = vst [vmem:[%s1676_s27 + $0x78] sm:$0xff] %v893_v7 }
 0x16f PF: > { %s1144_s20 = sshll.u32 %s1500_s21, 10  ;;  %s929_s25 = sshll.u32 %s1739_s18, 4  ;;  %s1811_s25 = int_to_ptr.vmem [resolvable:$true] %s929_s25 }
 0x170   : > { %s1808_s14 = scalar_lea.hbm %s1876_s3, %s1144_s20  ;;  %s1892_s26 = sand.u32 1, %s1480_s16  }
 0x171   : > { %s1815_s30 = scalar_lea.sflag [#allocation5], %s1892_s26  ;;  %s1402_s27 = scalar_lea.vmem %s1811_s25, 1024 }
 0x172   : > { %p1403_p8 = scmp.ne.s32.totalorder %s1811_s25, %s1402_s27  ;;  %s1514_s21 = smov [#allocation4]  }
 0x173   : > { %s1406_s8 = sshll.u32 %s1514_s21, 4  ;;  %s1407_s8 = int_to_ptr.vmem [resolvable:$false] %s1406_s8 }
 0x174   : > { %p1404_p9 = pnand %p1403_p8, %p1614_p7  ;;  %s1408_s9 = scalar_lea.vmem %s1407_s8, 2048 }
 0x175   : > { %p1409_p11 = scmp.lt.s32.totalorder %s1811_s25, %s1407_s8  ;;  %p1410_p13 = scmp.lt.s32.totalorder %s1408_s9, %s1402_s27 }
 0x176   : > { %p1405_p10 = pneg %p1404_p9 }
 0x177   : > { %p1411_p0 = por %p1410_p13, %p1409_p11 }
 0x179   : > { %p1412_p1 = pnand %p1411_p0, %p1405_p10 }
 0x17b   : > { %1415 = shalt.err (!%p1412_p1)
}
 0x17c   : > { %s1416_s6 = scalar_lea.hbm %s1808_s14, 1024  ;;  %s1420_s0 = scalar_lea.hbm %s1876_s3, 6144 }
 0x17d   : > { %p1417_p2 = scmp.ne.s32.totalorder %s1808_s14, %s1416_s6  ;;  %p1421_p5 = scmp.lt.u32.totalorder %s1808_s14, %s1876_s3 }
 0x17e   : > { %p1422_p6 = scmp.lt.u32.totalorder %s1420_s0, %s1416_s6  ;;  %p1424_p9 = scmp.lt.u32.totalorder %s1416_s6, %s1808_s14 }
 0x17f   : > { %p1418_p3 = pnand %p1417_p2, %p1614_p7 }
 0x180   : > { %p1423_p8 = por %p1422_p6, %p1421_p5 }
 0x181   : > { %p1419_p4 = pneg %p1418_p3 }
 0x182   : > { %p1425_p10 = por %p1424_p9, %p1423_p8 }
 0x184   : > { %p1426_p11 = pnand %p1425_p10, %p1419_p4 }
 0x186   : > { %1429 = shalt.err (!%p1426_p11)
}
 0x187   : > { %s1515_s18 = smov 64   ;;  %s1516_s20 = smov 4  }
 0x188   : > { %1273 = dma.vmem_to_hbm [thread:$0]  (%p1614_p7), %s1811_s25, 1024, %s1808_s14, %s1815_s30, %s1515_s18, %s1515_s18, %s1516_s20  }
 0x189 PF: > { %p1279_p13 = scmp.ge.s32.totalorder %s1512_s24, 2  ;;  %s948_s28 = sand.u32 1, %s1476_s15  }
 0x18a   : > { %s949_s13 = scalar_lea.sflag [#allocation5], %s948_s28 }
 0x18b   : > { %p1276_p0 = pnand %p1279_p13, %p1622_p12 }
 0x18d   : > { %1471 = dma.done.wait (!%p1276_p0), %s949_s13, 1024  }
 0x18e   : > { %1473 = vsyncadd (!%p1276_p0), %s949_s13, 4294966272  ;;  %s18_s24 = sadd.s32 1, %s1512_s24   ;;  %s1893_s20 = sld [smem:[#allocation7_spill]] }
 0x18f   : > { %p15_p1 = scmp.ge.s32.totalorder %s18_s24, 20   ;;  %s1894_s21 = sld [smem:[#allocation8_spill]] }
 0x190   : > { %s1895_s22 = sld [smem:[#allocation9_spill]]  ;;  %s1896_s23 = sld [smem:[#allocation10_spill]] }
 0x191   : > { %s1897_s15 = smov %s1480_s16  ;;  %s1898_s16 = smov %s1484_s17 }
 0x192   : > { %s1899_s17 = smov %s1627_s11  ;;  %s1900_s18 = smov %s1492_s19 }
 0x193   : > { %s1901_s19 = smov %s1630_s12  ;;  %17 = sbr.rel (!%p15_p1) target bundleno = 8 (0x8), region = 138 }
 0x19a   :  { %962 = vsyncpa [#allocation5], 1 }
 0x19b   :  { %964 = vsyncpa [#allocation5 + $0x1], 1 }

</bundles_post_ra>
